<compile_context>
chip_gen: v7x
topology: tpu7x:2x2x1
jax: 0.10.0
libtpu: 0.0.40
codegen_flags: <defaults>
</compile_context>

<pallas_src>
import functools
import math

import jax
import jax.numpy as jnp
from jax.experimental import pallas as pl
from jax.experimental.pallas import tpu as pltpu


# ----------------------------------------------------------------------------
# Kernels
# ----------------------------------------------------------------------------
def _dense_matmul_kernel(x_ref, w_ref, o_ref):
    """support = x @ W  (row-tiled skinny matmul, f32 accumulation)."""
    o_ref[...] = jnp.dot(
        x_ref[...], w_ref[...], preferred_element_type=jnp.float32
    ).astype(o_ref.dtype)


def _gcn_layer1_kernel(adj_ref, s1_ref, b1_ref, w2_ref, s2_ref, acc_ref):
    """support2 = relu(adj @ support1 + b1) @ W2, tiled over (row, k)."""
    k = pl.program_id(1)
    tk = adj_ref.shape[1]  # static block width of the adj tile

    @pl.when(k == 0)
    def _():
        acc_ref[...] = jnp.zeros_like(acc_ref)

    start = pl.multiple_of(k * tk, tk)
    s1_k = s1_ref[pl.ds(start, tk), :]  # resident support rows for this k tile
    acc_ref[...] += jnp.dot(
        adj_ref[...], s1_k, preferred_element_type=jnp.float32
    )

    @pl.when(k == pl.num_programs(1) - 1)
    def _():
        h = jnp.maximum(acc_ref[...] + b1_ref[...], 0.0)  # f32 epilogue
        s2_ref[...] = jnp.dot(
            h.astype(w2_ref.dtype), w2_ref[...],
            preferred_element_type=jnp.float32,
        ).astype(s2_ref.dtype)


def _gcn_layer2_kernel(adj_ref, s2_ref, b2_ref, o_ref, acc_ref):
    """out = relu(adj @ support2 + b2), tiled over (row, k)."""
    k = pl.program_id(1)
    tk = adj_ref.shape[1]

    @pl.when(k == 0)
    def _():
        acc_ref[...] = jnp.zeros_like(acc_ref)

    start = pl.multiple_of(k * tk, tk)
    s2_k = s2_ref[pl.ds(start, tk), :]
    acc_ref[...] += jnp.dot(
        adj_ref[...], s2_k, preferred_element_type=jnp.float32
    )

    @pl.when(k == pl.num_programs(1) - 1)
    def _():
        o_ref[...] = jnp.maximum(acc_ref[...] + b2_ref[...], 0.0).astype(o_ref.dtype)


# ----------------------------------------------------------------------------
# Wrapper
# ----------------------------------------------------------------------------
def _round_up(v, m):
    return ((v + m - 1) // m) * m


def _pad_to(a, rows, cols, dtype):
    out = jnp.zeros((rows, cols), dtype=dtype)
    return out.at[: a.shape[0], : a.shape[1]].set(a.astype(dtype))


@functools.partial(jax.jit, static_argnames=("block_rows", "block_cols"))
def attribute_decoder(x, adj, w1, b1, w2, b2, *, block_rows=256, block_cols=512):
    """Attribute_Decoder forward pass (eval mode).

    x:   [N, nhid] f32     adj: [N, N] f32 (normalized dense adjacency)
    w1:  [nhid, nhid], b1: [1, nhid] (or [nhid])
    w2:  [nhid, nfeat], b2: [1, nfeat] (or [nfeat])
    returns: [N, nfeat] f32
    """
    N, nhid = x.shape
    nfeat = w2.shape[1]

    # Lane-dense padded feature widths.
    c_pad = _round_up(nhid, 128)
    f_pad = _round_up(nfeat, 128)

    # Tile sizes: clamp for small graphs, keep multiples of 128.
    tm = min(block_rows, _round_up(N, 128))
    tk = min(block_cols, _round_up(N, 128))
    n_pad = _round_up(N, math.lcm(tm, tk))

    # Pad + cast.  adj/x/weights go to bf16 for the MXU (f32 accumulation in
    # kernel), biases stay f32 for the epilogue.  Pad rows/cols are zero, so
    # they contribute nothing and are sliced off at the end.
    adj_p = _pad_to(adj, n_pad, n_pad, jnp.bfloat16)
    x_p = _pad_to(x, n_pad, c_pad, jnp.bfloat16)
    w1_p = _pad_to(w1, c_pad, c_pad, jnp.bfloat16)
    w2_p = _pad_to(w2, c_pad, f_pad, jnp.bfloat16)
    b1_p = _pad_to(b1.reshape(1, -1), 1, c_pad, jnp.float32)
    b2_p = _pad_to(b2.reshape(1, -1), 1, f_pad, jnp.float32)

    vmem_limit = 32 * 1024 * 1024  # explicit; actual usage is far below it

    # --- support1 = x @ W1  (skinny, row-tiled) -----------------------------
    support1 = pl.pallas_call(
        _dense_matmul_kernel,
        out_shape=jax.ShapeDtypeStruct((n_pad, c_pad), jnp.bfloat16),
        grid_spec=pltpu.PrefetchScalarGridSpec(
            num_scalar_prefetch=0,
            grid=(n_pad // tm,),
            in_specs=[
                pl.BlockSpec((tm, c_pad), lambda i: (i, 0)),
                pl.BlockSpec((c_pad, c_pad), lambda i: (0, 0)),
            ],
            out_specs=pl.BlockSpec((tm, c_pad), lambda i: (i, 0)),
        ),
        compiler_params=pltpu.CompilerParams(
            dimension_semantics=("parallel",),
            vmem_limit_bytes=vmem_limit,
        ),
    )(x_p, w1_p)

    grid = (n_pad // tm, n_pad // tk)

    # --- layer 1 (+ fused W2 projection): support2 = relu(adj@s1 + b1) @ W2 --
    support2 = pl.pallas_call(
        _gcn_layer1_kernel,
        out_shape=jax.ShapeDtypeStruct((n_pad, f_pad), jnp.bfloat16),
        grid_spec=pltpu.PrefetchScalarGridSpec(
            num_scalar_prefetch=0,
            grid=grid,
            in_specs=[
                pl.BlockSpec((tm, tk), lambda i, k: (i, k)),        # adj: streamed once
                pl.BlockSpec((n_pad, c_pad), lambda i, k: (0, 0)),  # support1: resident
                pl.BlockSpec((1, c_pad), lambda i, k: (0, 0)),      # b1: resident
                pl.BlockSpec((c_pad, f_pad), lambda i, k: (0, 0)),  # W2: resident
            ],
            out_specs=pl.BlockSpec((tm, f_pad), lambda i, k: (i, 0)),
            scratch_shapes=[pltpu.VMEM((tm, c_pad), jnp.float32)],
        ),
        compiler_params=pltpu.CompilerParams(
            dimension_semantics=("parallel", "arbitrary"),
            vmem_limit_bytes=vmem_limit,
        ),
        cost_estimate=pl.CostEstimate(
            flops=2 * n_pad * n_pad * c_pad + 2 * n_pad * c_pad * f_pad,
            transcendentals=0,
            bytes_accessed=2 * n_pad * n_pad + 2 * n_pad * (c_pad + f_pad),
        ),
    )(adj_p, support1, b1_p, w2_p)

    # --- layer 2: out = relu(adj @ support2 + b2) ----------------------------
    out_p = pl.pallas_call(
        _gcn_layer2_kernel,
        out_shape=jax.ShapeDtypeStruct((n_pad, f_pad), jnp.float32),
        grid_spec=pltpu.PrefetchScalarGridSpec(
            num_scalar_prefetch=0,
            grid=grid,
            in_specs=[
                pl.BlockSpec((tm, tk), lambda i, k: (i, k)),        # adj: streamed once
                pl.BlockSpec((n_pad, f_pad), lambda i, k: (0, 0)),  # support2: resident
                pl.BlockSpec((1, f_pad), lambda i, k: (0, 0)),      # b2: resident
            ],
            out_specs=pl.BlockSpec((tm, f_pad), lambda i, k: (i, 0)),
            scratch_shapes=[pltpu.VMEM((tm, f_pad), jnp.float32)],
        ),
        compiler_params=pltpu.CompilerParams(
            dimension_semantics=("parallel", "arbitrary"),
            vmem_limit_bytes=vmem_limit,
        ),
        cost_estimate=pl.CostEstimate(
            flops=2 * n_pad * n_pad * f_pad,
            transcendentals=0,
            bytes_accessed=2 * n_pad * n_pad + 6 * n_pad * f_pad,
        ),
    )(adj_p, support2, b2_p)

    return out_p[:N, :nfeat]


# ----------------------------------------------------------------------------
# Reference / params
# ----------------------------------------------------------------------------
def init_gcn_params(key, in_features, out_features):
    """Deterministic init matching GraphConvolution.reset_parameters."""
    stdv = 1.0 / math.sqrt(out_features)
    kw, kb = jax.random.split(key)
    w = jax.random.uniform(kw, (in_features, out_features),
                           minval=-stdv, maxval=stdv, dtype=jnp.float32)
    b = jax.random.uniform(kb, (1, out_features),
                           minval=-stdv, maxval=stdv, dtype=jnp.float32)
    return w, b


def reference_forward(x, adj, w1, b1, w2, b2):
    h = jnp.maximum(adj @ (x @ w1) + b1, 0.0)
    return jnp.maximum(adj @ (h @ w2) + b2, 0.0)


if __name__ == "__main__":
    # Small shapes consistent with the module: N nodes, nhid hidden, nfeat output feats.
    N, nhid, nfeat = 256, 32, 16

    key = jax.random.PRNGKey(0)
    kx, kadj, k1, k2 = jax.random.split(key, 4)

    x = jax.random.normal(kx, (N, nhid), dtype=jnp.float32)

    # Symmetric, row-normalized adjacency (dense stand-in for the spmm input).
    a = (jax.random.uniform(kadj, (N, N)) < 0.1).astype(jnp.float32)
    a = jnp.maximum(a, a.T) + jnp.eye(N, dtype=jnp.float32)
    deg = jnp.sum(a, axis=1, keepdims=True)
    adj = a / deg

    w1, b1 = init_gcn_params(k1, nhid, nhid)   # gc1: nhid -> nhid
    w2, b2 = init_gcn_params(k2, nhid, nfeat)  # gc2: nhid -> nfeat

    out = attribute_decoder(x, adj, w1, b1, w2, b2)
    out = jax.block_until_ready(out)

    ref = reference_forward(x, adj, w1, b1, w2, b2)
    assert out.shape == (N, nfeat)
    max_err = float(jnp.max(jnp.abs(out - ref)))
    # adj / support inputs are bf16 (f32 accumulation) => loosened tolerance vs f32 ref.
    assert jnp.allclose(out, ref, atol=5e-2, rtol=5e-2), \
        f"mismatch vs reference (max abs err {max_err})"

    print("KERNEL_OK")
</pallas_src>

<mosaic_0001>
module attributes {stable_mosaic.version = 11 : i64} {
  func.func @_dense_matmul_kernel(%arg0: i32, %arg1: memref<256x128xbf16, #tpu.memory_space<vmem>>, %arg2: memref<128x128xbf16, #tpu.memory_space<vmem>>, %arg3: memref<256x128xbf16, #tpu.memory_space<vmem>>) attributes {dimension_semantics = [#tpu.dimension_semantics<parallel>], iteration_bounds = array<i64: 1>, scalar_prefetch = 0 : i64, scratch_operands = 0 : i64, tpu.core_type = #tpu.core_type<tc>, window_params = [{transform_indices = @transform_0, window_bounds = array<i64: 256, 128>}, {pipeline_mode = #tpu.pipeline_mode<synchronous>, transform_indices = @transform_1, window_bounds = array<i64: 128, 128>}, {transform_indices = @transform_2, window_bounds = array<i64: 256, 128>}]} {
    %c0 = arith.constant 0 : index
    %c0_0 = arith.constant 0 : index
    %0 = vector.load %arg1[%c0, %c0_0] : memref<256x128xbf16, #tpu.memory_space<vmem>>, vector<256x128xbf16>
    %c0_1 = arith.constant 0 : index
    %c0_2 = arith.constant 0 : index
    %1 = vector.load %arg2[%c0_1, %c0_2] : memref<128x128xbf16, #tpu.memory_space<vmem>>, vector<128x128xbf16>
    %cst = arith.constant dense<0.000000e+00> : vector<256x128xf32>
    %2 = tpu.matmul %0, %1, %cst {dimension_numbers = #tpu.dot_dimension_numbers<[1], [0], [0], [1], [0, 0, 1, 1], [], []>} : vector<256x128xbf16>, vector<128x128xbf16>, vector<256x128xf32> -> vector<256x128xf32>
    %3 = arith.truncf %2 : vector<256x128xf32> to vector<256x128xbf16>
    %c0_3 = arith.constant 0 : index
    %c0_4 = arith.constant 0 : index
    %4 = vector.load %arg3[%c0_3, %c0_4] : memref<256x128xbf16, #tpu.memory_space<vmem>>, vector<256x128xbf16>
    tpu.vector_store %arg3[%c0_3, %c0_4], %3 {strides = array<i32>} : memref<256x128xbf16, #tpu.memory_space<vmem>>, vector<256x128xbf16>,
    return
  }
  func.func @transform_0(%arg0: i32) -> (i32, i32) {
    %c0_i32 = arith.constant 0 : i32
    %c0_i32_0 = arith.constant 0 : i32
    return %arg0, %c0_i32 : i32, i32
  }
  func.func @transform_1(%arg0: i32) -> (i32, i32) {
    %c0_i32 = arith.constant 0 : i32
    %c0_i32_0 = arith.constant 0 : i32
    %c0_i32_1 = arith.constant 0 : i32
    return %c0_i32, %c0_i32_0 : i32, i32
  }
  func.func @transform_2(%arg0: i32) -> (i32, i32) {
    %c0_i32 = arith.constant 0 : i32
    %c0_i32_0 = arith.constant 0 : i32
    return %arg0, %c0_i32 : i32, i32
  }
}

module attributes {stable_mosaic.version = 11 : i64} {
  func.func @_gcn_layer1_kernel(%arg0: i32, %arg1: i32, %arg2: memref<256x256xbf16, #tpu.memory_space<vmem>>, %arg3: memref<256x128xbf16, #tpu.memory_space<vmem>>, %arg4: memref<1x128xf32, #tpu.memory_space<vmem>>, %arg5: memref<128x128xbf16, #tpu.memory_space<vmem>>, %arg6: memref<256x128xbf16, #tpu.memory_space<vmem>>, %arg7: memref<256x128xf32, #tpu.memory_space<vmem>>) attributes {dimension_semantics = [#tpu.dimension_semantics<parallel>, #tpu.dimension_semantics<arbitrary>], iteration_bounds = array<i64: 1, 1>, scalar_prefetch = 0 : i64, scratch_operands = 1 : i64, tpu.core_type = #tpu.core_type<tc>, window_params = [{transform_indices = @transform_0, window_bounds = array<i64: 256, 256>}, {pipeline_mode = #tpu.pipeline_mode<synchronous>, transform_indices = @transform_1, window_bounds = array<i64: 256, 128>}, {pipeline_mode = #tpu.pipeline_mode<synchronous>, transform_indices = @transform_2, window_bounds = array<i64: 1, 128>}, {pipeline_mode = #tpu.pipeline_mode<synchronous>, transform_indices = @transform_3, window_bounds = array<i64: 128, 128>}, {transform_indices = @transform_4, window_bounds = array<i64: 256, 128>}]} {
    %c0_i32 = arith.constant 0 : i32
    %0 = arith.cmpi eq, %arg1, %c0_i32 : i32
    %1 = arith.extui %0 : i1 to i32
    %c0_i32_0 = arith.constant 0 : i32
    %2 = arith.cmpi ne, %1, %c0_i32_0 : i32
    scf.if %2 {
      %cst_9 = arith.constant 0.000000e+00 : f32
      %15 = vector.broadcast %cst_9 : f32 to vector<256x128xf32>
      %c0_10 = arith.constant 0 : index
      %c0_11 = arith.constant 0 : index
      %16 = vector.load %arg7[%c0_10, %c0_11] : memref<256x128xf32, #tpu.memory_space<vmem>>, vector<256x128xf32>
      tpu.vector_store %arg7[%c0_10, %c0_11], %15 {strides = array<i32>} : memref<256x128xf32, #tpu.memory_space<vmem>>, vector<256x128xf32>,
    } else {
    }
    %c256_i32 = arith.constant 256 : i32
    %3 = arith.muli %arg1, %c256_i32 : i32
    %4 = tpu.assume_multiple %3, 256 : i32
    %5 = arith.index_cast %4 : i32 to index
    %c0 = arith.constant 0 : index
    %6 = vector.load %arg3[%5, %c0] : memref<256x128xbf16, #tpu.memory_space<vmem>>, vector<256x128xbf16>
    %c0_1 = arith.constant 0 : index
    %c0_2 = arith.constant 0 : index
    %7 = vector.load %arg7[%c0_1, %c0_2] : memref<256x128xf32, #tpu.memory_space<vmem>>, vector<256x128xf32>
    %c0_3 = arith.constant 0 : index
    %c0_4 = arith.constant 0 : index
    %8 = vector.load %arg2[%c0_3, %c0_4] : memref<256x256xbf16, #tpu.memory_space<vmem>>, vector<256x256xbf16>
    %cst = arith.constant dense<0.000000e+00> : vector<256x128xf32>
    %9 = tpu.matmul %8, %6, %cst {dimension_numbers = #tpu.dot_dimension_numbers<[1], [0], [0], [1], [0, 0, 1, 1], [], []>} : vector<256x256xbf16>, vector<256x128xbf16>, vector<256x128xf32> -> vector<256x128xf32>
    %10 = arith.addf %7, %9 : vector<256x128xf32>
    %c0_5 = arith.constant 0 : index
    %c0_6 = arith.constant 0 : index
    %11 = vector.load %arg7[%c0_5, %c0_6] : memref<256x128xf32, #tpu.memory_space<vmem>>, vector<256x128xf32>
    tpu.vector_store %arg7[%c0_5, %c0_6], %10 {strides = array<i32>} : memref<256x128xf32, #tpu.memory_space<vmem>>, vector<256x128xf32>,
    %c0_i32_7 = arith.constant 0 : i32
    %12 = arith.cmpi eq, %arg1, %c0_i32_7 : i32
    %13 = arith.extui %12 : i1 to i32
    %c0_i32_8 = arith.constant 0 : i32
    %14 = arith.cmpi ne, %13, %c0_i32_8 : i32
    scf.if %14 {
      %c0_9 = arith.constant 0 : index
      %c0_10 = arith.constant 0 : index
      %15 = vector.load %arg7[%c0_9, %c0_10] : memref<256x128xf32, #tpu.memory_space<vmem>>, vector<256x128xf32>
      %c0_11 = arith.constant 0 : index
      %c0_12 = arith.constant 0 : index
      %16 = vector.load %arg4[%c0_11, %c0_12] : memref<1x128xf32, #tpu.memory_space<vmem>>, vector<1x128xf32>
      %17 = vector.broadcast %16 : vector<1x128xf32> to vector<256x128xf32>
      %18 = arith.addf %15, %17 : vector<256x128xf32>
      %cst_13 = arith.constant 0.000000e+00 : f32
      %19 = vector.broadcast %cst_13 : f32 to vector<256x128xf32>
      %20 = arith.maximumf %18, %19 : vector<256x128xf32>
      %21 = arith.truncf %20 : vector<256x128xf32> to vector<256x128xbf16>
      %c0_14 = arith.constant 0 : index
      %c0_15 = arith.constant 0 : index
      %22 = vector.load %arg5[%c0_14, %c0_15] : memref<128x128xbf16, #tpu.memory_space<vmem>>, vector<128x128xbf16>
      %cst_16 = arith.constant dense<0.000000e+00> : vector<256x128xf32>
      %23 = tpu.matmul %21, %22, %cst_16 {dimension_numbers = #tpu.dot_dimension_numbers<[1], [0], [0], [1], [0, 0, 1, 1], [], []>} : vector<256x128xbf16>, vector<128x128xbf16>, vector<256x128xf32> -> vector<256x128xf32>
      %24 = arith.truncf %23 : vector<256x128xf32> to vector<256x128xbf16>
      %c0_17 = arith.constant 0 : index
      %c0_18 = arith.constant 0 : index
      %25 = vector.load %arg6[%c0_17, %c0_18] : memref<256x128xbf16, #tpu.memory_space<vmem>>, vector<256x128xbf16>
      tpu.vector_store %arg6[%c0_17, %c0_18], %24 {strides = array<i32>} : memref<256x128xbf16, #tpu.memory_space<vmem>>, vector<256x128xbf16>,
    } else {
    }
    return
  }
  func.func @transform_0(%arg0: i32, %arg1: i32) -> (i32, i32) {
    %c0_i32 = arith.constant 0 : i32
    return %arg0, %arg1 : i32, i32
  }
  func.func @transform_1(%arg0: i32, %arg1: i32) -> (i32, i32) {
    %c0_i32 = arith.constant 0 : i32
    %c0_i32_0 = arith.constant 0 : i32
    %c0_i32_1 = arith.constant 0 : i32
    return %c0_i32, %c0_i32_0 : i32, i32
  }
  func.func @transform_2(%arg0: i32, %arg1: i32) -> (i32, i32) {
    %c0_i32 = arith.constant 0 : i32
    %c0_i32_0 = arith.constant 0 : i32
    %c0_i32_1 = arith.constant 0 : i32
    return %c0_i32, %c0_i32_0 : i32, i32
  }
  func.func @transform_3(%arg0: i32, %arg1: i32) -> (i32, i32) {
    %c0_i32 = arith.constant 0 : i32
    %c0_i32_0 = arith.constant 0 : i32
    %c0_i32_1 = arith.constant 0 : i32
    return %c0_i32, %c0_i32_0 : i32, i32
  }
  func.func @transform_4(%arg0: i32, %arg1: i32) -> (i32, i32) {
    %c0_i32 = arith.constant 0 : i32
    %c0_i32_0 = arith.constant 0 : i32
    return %arg0, %c0_i32 : i32, i32
  }
}

module attributes {stable_mosaic.version = 11 : i64} {
  func.func @_gcn_layer2_kernel(%arg0: i32, %arg1: i32, %arg2: memref<256x256xbf16, #tpu.memory_space<vmem>>, %arg3: memref<256x128xbf16, #tpu.memory_space<vmem>>, %arg4: memref<1x128xf32, #tpu.memory_space<vmem>>, %arg5: memref<256x128xf32, #tpu.memory_space<vmem>>, %arg6: memref<256x128xf32, #tpu.memory_space<vmem>>) attributes {dimension_semantics = [#tpu.dimension_semantics<parallel>, #tpu.dimension_semantics<arbitrary>], iteration_bounds = array<i64: 1, 1>, scalar_prefetch = 0 : i64, scratch_operands = 1 : i64, tpu.core_type = #tpu.core_type<tc>, window_params = [{transform_indices = @transform_0, window_bounds = array<i64: 256, 256>}, {pipeline_mode = #tpu.pipeline_mode<synchronous>, transform_indices = @transform_1, window_bounds = array<i64: 256, 128>}, {pipeline_mode = #tpu.pipeline_mode<synchronous>, transform_indices = @transform_2, window_bounds = array<i64: 1, 128>}, {transform_indices = @transform_3, window_bounds = array<i64: 256, 128>}]} {
    %c0_i32 = arith.constant 0 : i32
    %0 = arith.cmpi eq, %arg1, %c0_i32 : i32
    %1 = arith.extui %0 : i1 to i32
    %c0_i32_0 = arith.constant 0 : i32
    %2 = arith.cmpi ne, %1, %c0_i32_0 : i32
    scf.if %2 {
      %cst_9 = arith.constant 0.000000e+00 : f32
      %15 = vector.broadcast %cst_9 : f32 to vector<256x128xf32>
      %c0_10 = arith.constant 0 : index
      %c0_11 = arith.constant 0 : index
      %16 = vector.load %arg6[%c0_10, %c0_11] : memref<256x128xf32, #tpu.memory_space<vmem>>, vector<256x128xf32>
      tpu.vector_store %arg6[%c0_10, %c0_11], %15 {strides = array<i32>} : memref<256x128xf32, #tpu.memory_space<vmem>>, vector<256x128xf32>,
    } else {
    }
    %c256_i32 = arith.constant 256 : i32
    %3 = arith.muli %arg1, %c256_i32 : i32
    %4 = tpu.assume_multiple %3, 256 : i32
    %5 = arith.index_cast %4 : i32 to index
    %c0 = arith.constant 0 : index
    %6 = vector.load %arg3[%5, %c0] : memref<256x128xbf16, #tpu.memory_space<vmem>>, vector<256x128xbf16>
    %c0_1 = arith.constant 0 : index
    %c0_2 = arith.constant 0 : index
    %7 = vector.load %arg6[%c0_1, %c0_2] : memref<256x128xf32, #tpu.memory_space<vmem>>, vector<256x128xf32>
    %c0_3 = arith.constant 0 : index
    %c0_4 = arith.constant 0 : index
    %8 = vector.load %arg2[%c0_3, %c0_4] : memref<256x256xbf16, #tpu.memory_space<vmem>>, vector<256x256xbf16>
    %cst = arith.constant dense<0.000000e+00> : vector<256x128xf32>
    %9 = tpu.matmul %8, %6, %cst {dimension_numbers = #tpu.dot_dimension_numbers<[1], [0], [0], [1], [0, 0, 1, 1], [], []>} : vector<256x256xbf16>, vector<256x128xbf16>, vector<256x128xf32> -> vector<256x128xf32>
    %10 = arith.addf %7, %9 : vector<256x128xf32>
    %c0_5 = arith.constant 0 : index
    %c0_6 = arith.constant 0 : index
    %11 = vector.load %arg6[%c0_5, %c0_6] : memref<256x128xf32, #tpu.memory_space<vmem>>, vector<256x128xf32>
    tpu.vector_store %arg6[%c0_5, %c0_6], %10 {strides = array<i32>} : memref<256x128xf32, #tpu.memory_space<vmem>>, vector<256x128xf32>,
    %c0_i32_7 = arith.constant 0 : i32
    %12 = arith.cmpi eq, %arg1, %c0_i32_7 : i32
    %13 = arith.extui %12 : i1 to i32
    %c0_i32_8 = arith.constant 0 : i32
    %14 = arith.cmpi ne, %13, %c0_i32_8 : i32
    scf.if %14 {
      %c0_9 = arith.constant 0 : index
      %c0_10 = arith.constant 0 : index
      %15 = vector.load %arg6[%c0_9, %c0_10] : memref<256x128xf32, #tpu.memory_space<vmem>>, vector<256x128xf32>
      %c0_11 = arith.constant 0 : index
      %c0_12 = arith.constant 0 : index
      %16 = vector.load %arg4[%c0_11, %c0_12] : memref<1x128xf32, #tpu.memory_space<vmem>>, vector<1x128xf32>
      %17 = vector.broadcast %16 : vector<1x128xf32> to vector<256x128xf32>
      %18 = arith.addf %15, %17 : vector<256x128xf32>
      %cst_13 = arith.constant 0.000000e+00 : f32
      %19 = vector.broadcast %cst_13 : f32 to vector<256x128xf32>
      %20 = arith.maximumf %18, %19 : vector<256x128xf32>
      %c0_14 = arith.constant 0 : index
      %c0_15 = arith.constant 0 : index
      %21 = vector.load %arg5[%c0_14, %c0_15] : memref<256x128xf32, #tpu.memory_space<vmem>>, vector<256x128xf32>
      tpu.vector_store %arg5[%c0_14, %c0_15], %20 {strides = array<i32>} : memref<256x128xf32, #tpu.memory_space<vmem>>, vector<256x128xf32>,
    } else {
    }
    return
  }
  func.func @transform_0(%arg0: i32, %arg1: i32) -> (i32, i32) {
    %c0_i32 = arith.constant 0 : i32
    return %arg0, %arg1 : i32, i32
  }
  func.func @transform_1(%arg0: i32, %arg1: i32) -> (i32, i32) {
    %c0_i32 = arith.constant 0 : i32
    %c0_i32_0 = arith.constant 0 : i32
    %c0_i32_1 = arith.constant 0 : i32
    return %c0_i32, %c0_i32_0 : i32, i32
  }
  func.func @transform_2(%arg0: i32, %arg1: i32) -> (i32, i32) {
    %c0_i32 = arith.constant 0 : i32
    %c0_i32_0 = arith.constant 0 : i32
    %c0_i32_1 = arith.constant 0 : i32
    return %c0_i32, %c0_i32_0 : i32, i32
  }
  func.func @transform_3(%arg0: i32, %arg1: i32) -> (i32, i32) {
    %c0_i32 = arith.constant 0 : i32
    %c0_i32_0 = arith.constant 0 : i32
    return %arg0, %c0_i32 : i32, i32
  }
}

</mosaic_0001>

<bundles_post_ra>
// kernel: attribute_decoder.3
= control target key start
LH: loop header
LB: loop body
LE: loop exit
PB: predicated region body
PF: predicated region fallthrough
CT: control target
= control target key end

     0   :  { %s959_s1 = inlined_call_operand.vmem [shape: bf16[128,128], index: 1, kind: input, shape index: {}]   ;;  %s960_s0 = inlined_call_operand.vmem [shape: bf16[256,128], index: 0, kind: input, shape index: {}]   ;;  %s961_s2 = inlined_call_operand.vmem [shape: bf16[256,128], index: 2, kind: output, shape index: {}]  }
   0x1   :  { %v800_v0 = vld [vmem:[%s959_s1] sm:$0xff]   ;;  %v801_v1 = vld [vmem:[%s959_s1 + $0x8] sm:$0xff]   ;;  %v802_v2 = vld [vmem:[%s959_s1 + $0x10] sm:$0xff]  }
   0x2   :  { %736 = vmatprep.subr.bf16.mxu0 %v800_v0  ;;  %784 = vmatprep.subr.bf16.mxu1 %v800_v0  ;;  %v803_v3 = vld [vmem:[%s959_s1 + $0x18] sm:$0xff]   ;;  %v808_v4 = vld [vmem:[%s960_s0] sm:$0xff]   ;;  %v805_v7 = vld [vmem:[%s959_s1 + $0x28] sm:$0xff]  }
   0x3   :  { %737 = vmatpush3.bf16.msra.mxu0 %v800_v0  ;;  %792 = vmatpush3.bf16.msra.mxu1 %v800_v0  ;;  %v809_v5 = vld [vmem:[%s960_s0 + $0x40] sm:$0xff]   ;;  %v806_v8 = vld [vmem:[%s959_s1 + $0x30] sm:$0xff]   ;;  %v807_v9 = vld [vmem:[%s959_s1 + $0x38] sm:$0xff]  }
   0x4   :  { %738 = vmatprep.subr.bf16.mxu0 %v801_v1  ;;  %785 = vmatprep.subr.bf16.mxu1 %v801_v1  ;;  %v804_v6 = vld [vmem:[%s959_s1 + $0x20] sm:$0xff]   ;;  %v810_v10 = vld [vmem:[%s960_s0 + $0x8] sm:$0xff]   ;;  %v812_v12 = vld [vmem:[%s960_s0 + $0x10] sm:$0xff]  }
   0x5   :  { %752 = vmatprep.mubr.bf16.mxu0 %v808_v4  ;;  %768 = vmatprep.mubr.bf16.mxu1 %v809_v5  ;;  %v811_v11 = vld [vmem:[%s960_s0 + $0x48] sm:$0xff]   ;;  %v813_v13 = vld [vmem:[%s960_s0 + $0x50] sm:$0xff]   ;;  %v814_v14 = vld [vmem:[%s960_s0 + $0x18] sm:$0xff]  }
   0x6   :  { %v815_v15 = vld [vmem:[%s960_s0 + $0x58] sm:$0xff]   ;;  %v816_v16 = vld [vmem:[%s960_s0 + $0x20] sm:$0xff]   ;;  %v818_v18 = vld [vmem:[%s960_s0 + $0x28] sm:$0xff]  }
   0x7   :  { %739 = vmatpush3.bf16.msra.mxu0 %v801_v1  ;;  %793 = vmatpush3.bf16.msra.mxu1 %v801_v1  ;;  %v817_v17 = vld [vmem:[%s960_s0 + $0x60] sm:$0xff]   ;;  %v819_v19 = vld [vmem:[%s960_s0 + $0x68] sm:$0xff]   ;;  %v820_v20 = vld [vmem:[%s960_s0 + $0x30] sm:$0xff]  }
   0x8   :  { %740 = vmatprep.subr.bf16.mxu0 %v802_v2  ;;  %786 = vmatprep.subr.bf16.mxu1 %v802_v2  ;;  %v821_v21 = vld [vmem:[%s960_s0 + $0x70] sm:$0xff]   ;;  %v822_v22 = vld [vmem:[%s960_s0 + $0x38] sm:$0xff]  }
   0x9   :  { %v823_v23 = vld [vmem:[%s960_s0 + $0x78] sm:$0xff]  }
   0xb   :  { %741 = vmatpush3.bf16.msra.mxu0 %v802_v2  ;;  %794 = vmatpush3.bf16.msra.mxu1 %v802_v2 }
   0xc   :  { %742 = vmatprep.subr.bf16.mxu0 %v803_v3  ;;  %787 = vmatprep.subr.bf16.mxu1 %v803_v3 }
   0xf   :  { %743 = vmatpush3.bf16.msra.mxu0 %v803_v3  ;;  %795 = vmatpush3.bf16.msra.mxu1 %v803_v3 }
  0x10   :  { %744 = vmatprep.subr.bf16.mxu0 %v804_v6  ;;  %788 = vmatprep.subr.bf16.mxu1 %v804_v6 }
  0x13   :  { %745 = vmatpush3.bf16.msra.mxu0 %v804_v6  ;;  %796 = vmatpush3.bf16.msra.mxu1 %v804_v6 }
  0x14   :  { %746 = vmatprep.subr.bf16.mxu0 %v805_v7  ;;  %789 = vmatprep.subr.bf16.mxu1 %v805_v7 }
  0x17   :  { %747 = vmatpush3.bf16.msra.mxu0 %v805_v7  ;;  %797 = vmatpush3.bf16.msra.mxu1 %v805_v7 }
  0x18   :  { %748 = vmatprep.subr.bf16.mxu0 %v806_v8  ;;  %790 = vmatprep.subr.bf16.mxu1 %v806_v8 }
  0x1b   :  { %749 = vmatpush3.bf16.msra.mxu0 %v806_v8  ;;  %798 = vmatpush3.bf16.msra.mxu1 %v806_v8 }
  0x1c   :  { %750 = vmatprep.subr.bf16.mxu0 %v807_v9  ;;  %791 = vmatprep.subr.bf16.mxu1 %v807_v9 }
  0x1f   :  { %751 = vmatpush3.bf16.msra.mxu0 %v807_v9  ;;  %799 = vmatpush3.bf16.msra.mxu1 %v807_v9 }
  0x22   :  { %753 = vmatmul.mubr.bf16.vlgmr.msra.gmra.mrb[0].mxu0 %v810_v10  ;;  %769 = vmatmul.mubr.bf16.vlgmr.msra.gmra.mrb[0].mxu1 %v811_v11 }
  0x23   :  { %756 = vmatprep.mubr.bf16.mxu0 %v812_v12  ;;  %772 = vmatprep.mubr.bf16.mxu1 %v813_v13 }
  0x2a   :  { %757 = vmatmul.mubr.bf16.gmra.mrb[4].mxu0 %v814_v14  ;;  %773 = vmatmul.mubr.bf16.gmra.mrb[4].mxu1 %v815_v15 }
  0x2b   :  { %760 = vmatprep.mubr.bf16.mxu0 %v816_v16  ;;  %776 = vmatprep.mubr.bf16.mxu1 %v817_v17 }
  0x32   :  { %761 = vmatmul.mubr.bf16.gmra.mrb[8].mxu0 %v818_v18  ;;  %777 = vmatmul.mubr.bf16.gmra.mrb[8].mxu1 %v819_v19 }
  0x33   :  { %764 = vmatprep.mubr.bf16.mxu0 %v820_v20  ;;  %780 = vmatprep.mubr.bf16.mxu1 %v821_v21 }
  0x3a   :  { %765 = vmatmul.mubr.bf16.gmra.mrb[12].mxu0 %v822_v22  ;;  %781 = vmatmul.mubr.bf16.gmra.mrb[12].mxu1 %v823_v23 }
  0xf5   :  { %v754_v24 = vpop.f32.mrb[0].mxu0  ;;  %v770_v25 = vpop.f32.mrb[0].mxu1 }
  0xf6   :  { %v238_v26 = vpop.f32.mrb[1].mxu0  ;;  %v302_v27 = vpop.f32.mrb[1].mxu1 }
  0xf7   :  { %v755_v28 = vpop.f32.mrb[2].mxu0  ;;  %v771_v29 = vpop.f32.mrb[2].mxu1 }
  0xf8   :  { %v625_v30 = vpack.c.bf16 %v755_v28, %v754_v24  ;;  %v665_v31 = vpack.c.bf16 %v771_v29, %v770_v25  ;;  %v241_v32 = vpop.f32.mrb[3].mxu0  ;;  %v305_v33 = vpop.f32.mrb[3].mxu1 }
  0xf9   :  { %v620_v34 = vpack.c.bf16 %v241_v32, %v238_v26  ;;  %v660_v35 = vpack.c.bf16 %v305_v33, %v302_v27 }
  0xfa   :  { %697 = vst [vmem:[%s961_s2 + $0x8] sm:$0xff] %v625_v30   ;;  %705 = vst [vmem:[%s961_s2 + $0x48] sm:$0xff] %v665_v31  }
  0xfb   :  { %621 = vst [vmem:[%s961_s2] sm:$0xff] %v620_v34   ;;  %704 = vst [vmem:[%s961_s2 + $0x40] sm:$0xff] %v660_v35  }
  0xfd   :  { %v758_v36 = vpop.f32.mrb[4].mxu0  ;;  %v774_v37 = vpop.f32.mrb[4].mxu1 }
  0xfe   :  { %v254_v38 = vpop.f32.mrb[5].mxu0  ;;  %v318_v39 = vpop.f32.mrb[5].mxu1 }
  0xff   :  { %v759_v40 = vpop.f32.mrb[6].mxu0  ;;  %v775_v41 = vpop.f32.mrb[6].mxu1 }
 0x100   :  { %v635_v42 = vpack.c.bf16 %v759_v40, %v758_v36  ;;  %v675_v43 = vpack.c.bf16 %v775_v41, %v774_v37  ;;  %v257_v44 = vpop.f32.mrb[7].mxu0  ;;  %v321_v45 = vpop.f32.mrb[7].mxu1 }
 0x101   :  { %v630_v46 = vpack.c.bf16 %v257_v44, %v254_v38  ;;  %v670_v47 = vpack.c.bf16 %v321_v45, %v318_v39 }
 0x102   :  { %699 = vst [vmem:[%s961_s2 + $0x18] sm:$0xff] %v635_v42   ;;  %707 = vst [vmem:[%s961_s2 + $0x58] sm:$0xff] %v675_v43  }
 0x103   :  { %698 = vst [vmem:[%s961_s2 + $0x10] sm:$0xff] %v630_v46   ;;  %706 = vst [vmem:[%s961_s2 + $0x50] sm:$0xff] %v670_v47  }
 0x105   :  { %v762_v48 = vpop.f32.mrb[8].mxu0  ;;  %v778_v49 = vpop.f32.mrb[8].mxu1 }
 0x106   :  { %v270_v50 = vpop.f32.mrb[9].mxu0  ;;  %v334_v51 = vpop.f32.mrb[9].mxu1 }
 0x107   :  { %v763_v52 = vpop.f32.mrb[10].mxu0  ;;  %v779_v53 = vpop.f32.mrb[10].mxu1 }
 0x108   :  { %v645_v54 = vpack.c.bf16 %v763_v52, %v762_v48  ;;  %v685_v55 = vpack.c.bf16 %v779_v53, %v778_v49  ;;  %v273_v56 = vpop.f32.mrb[11].mxu0  ;;  %v337_v57 = vpop.f32.mrb[11].mxu1 }
 0x109   :  { %v640_v58 = vpack.c.bf16 %v273_v56, %v270_v50  ;;  %v680_v59 = vpack.c.bf16 %v337_v57, %v334_v51 }
 0x10a   :  { %701 = vst [vmem:[%s961_s2 + $0x28] sm:$0xff] %v645_v54   ;;  %709 = vst [vmem:[%s961_s2 + $0x68] sm:$0xff] %v685_v55  }
 0x10b   :  { %700 = vst [vmem:[%s961_s2 + $0x20] sm:$0xff] %v640_v58   ;;  %708 = vst [vmem:[%s961_s2 + $0x60] sm:$0xff] %v680_v59  }
 0x10d   :  { %v766_v60 = vpop.f32.mrb[12].mxu0  ;;  %v782_v61 = vpop.f32.mrb[12].mxu1 }
 0x10e   :  { %v286_v62 = vpop.f32.mrb[13].mxu0  ;;  %v350_v63 = vpop.f32.mrb[13].mxu1 }
 0x10f   :  { %v767_v0 = vpop.f32.mrb[14].mxu0  ;;  %v783_v1 = vpop.f32.mrb[14].mxu1 }
 0x110   :  { %v655_v2 = vpack.c.bf16 %v767_v0, %v766_v60  ;;  %v695_v3 = vpack.c.bf16 %v783_v1, %v782_v61  ;;  %v289_v4 = vpop.f32.mrb[15].mxu0  ;;  %v353_v5 = vpop.f32.mrb[15].mxu1 }
 0x111   :  { %v650_v6 = vpack.c.bf16 %v289_v4, %v286_v62  ;;  %v690_v7 = vpack.c.bf16 %v353_v5, %v350_v63 }
 0x112   :  { %703 = vst [vmem:[%s961_s2 + $0x38] sm:$0xff] %v655_v2   ;;  %711 = vst [vmem:[%s961_s2 + $0x78] sm:$0xff] %v695_v3  }
 0x113   :  { %702 = vst [vmem:[%s961_s2 + $0x30] sm:$0xff] %v650_v6   ;;  %710 = vst [vmem:[%s961_s2 + $0x70] sm:$0xff] %v690_v7  }

// kernel: attribute_decoder.5
= control target key start
LH: loop header
LB: loop body
LE: loop exit
PB: predicated region body
PF: predicated region fallthrough
CT: control target
= control target key end

     0   :  { %s1315_s1 = inlined_call_operand.vmem [shape: bf16[256,128], index: 1, kind: input, shape index: {}]   ;;  %s1316_s0 = inlined_call_operand.vmem [shape: bf16[256,256], index: 0, kind: input, shape index: {}]   ;;  %s1317_s2 = inlined_call_operand.vmem [shape: f32[1,128], index: 2, kind: input, shape index: {}]   ;;  %s1318_s3 = inlined_call_operand.vmem [shape: f32[256,128], index: 3, kind: output, shape index: {}]  }
   0x1   :  { %v954_v0 = vld [vmem:[%s1315_s1 + $0x40] sm:$0xff]   ;;  %v956_v2 = vld [vmem:[%s1315_s1 + $0x48] sm:$0xff]   ;;  %v958_v4 = vld [vmem:[%s1315_s1 + $0x50] sm:$0xff]  }
   0x2   :  { %v955_v1 = vld [vmem:[%s1315_s1] sm:$0xff]   ;;  %826 = vmatprep.subr.bf16.mxu0 %v954_v0  ;;  %938 = vmatprep.subr.bf16.mxu1 %v954_v0  ;;  %v957_v3 = vld [vmem:[%s1315_s1 + $0x8] sm:$0xff]   ;;  %v959_v5 = vld [vmem:[%s1315_s1 + $0x10] sm:$0xff]  }
   0x3   :  { %827 = vmatpush3.bf16.msra.mxu0 %v955_v1  ;;  %946 = vmatpush3.bf16.msra.mxu1 %v955_v1  ;;  %v960_v6 = vld [vmem:[%s1315_s1 + $0x58] sm:$0xff]   ;;  %v962_v8 = vld [vmem:[%s1315_s1 + $0x60] sm:$0xff]   ;;  %v964_v10 = vld [vmem:[%s1315_s1 + $0x68] sm:$0xff]  }
   0x4   :  { %828 = vmatprep.subr.bf16.mxu0 %v956_v2  ;;  %939 = vmatprep.subr.bf16.mxu1 %v956_v2  ;;  %v961_v7 = vld [vmem:[%s1315_s1 + $0x18] sm:$0xff]   ;;  %v963_v9 = vld [vmem:[%s1315_s1 + $0x20] sm:$0xff]   ;;  %v965_v13 = vld [vmem:[%s1315_s1 + $0x28] sm:$0xff]  }
   0x5   :  { %v972_v11 = vld [vmem:[%s1316_s0 + $0x4] ss:$8 sps:$4 sm:$0xff]   ;;  %v966_v14 = vld [vmem:[%s1315_s1 + $0x70] sm:$0xff]   ;;  %v968_v16 = vld [vmem:[%s1315_s1 + $0x78] sm:$0xff]  }
   0x6   :  { %v975_v12 = vld [vmem:[%s1316_s0 + $0x84] ss:$8 sps:$4 sm:$0xff]   ;;  %440 = vmatprep.mubr.bf16.mxu0 %v972_v11  ;;  %v967_v15 = vld [vmem:[%s1315_s1 + $0x30] sm:$0xff]   ;;  %v969_v17 = vld [vmem:[%s1315_s1 + $0x38] sm:$0xff]  }
   0x7   :  { %829 = vmatpush3.bf16.msra.mxu0 %v957_v3  ;;  %947 = vmatpush3.bf16.msra.mxu1 %v957_v3  ;;  %v970_v18 = vld [vmem:[%s1316_s0] ss:$8 sps:$4 sm:$0xff]   ;;  %v976_v20 = vld [vmem:[%s1316_s0 + $0x14] ss:$8 sps:$4 sm:$0xff]   ;;  %v980_v22 = vld [vmem:[%s1316_s0 + $0x10] ss:$8 sps:$4 sm:$0xff]  }
   0x8   :  { %830 = vmatprep.subr.bf16.mxu0 %v958_v4  ;;  %940 = vmatprep.subr.bf16.mxu1 %v958_v4  ;;  %v973_v19 = vld [vmem:[%s1316_s0 + $0x80] ss:$8 sps:$4 sm:$0xff]   ;;  %v978_v21 = vld [vmem:[%s1316_s0 + $0x94] ss:$8 sps:$4 sm:$0xff]   ;;  %v981_v23 = vld [vmem:[%s1316_s0 + $0x90] ss:$8 sps:$4 sm:$0xff]  }
   0x9   :  { %504 = vmatprep.mubr.bf16.mxu1 %v975_v12  ;;  %v982_v24 = vld [vmem:[%s1316_s0 + $0x24] ss:$8 sps:$4 sm:$0xff]   ;;  %v986_v26 = vld [vmem:[%s1316_s0 + $0x20] ss:$8 sps:$4 sm:$0xff]   ;;  %v988_v28 = vld [vmem:[%s1316_s0 + $0x34] ss:$8 sps:$4 sm:$0xff]  }
   0xa   :  { %v984_v25 = vld [vmem:[%s1316_s0 + $0xa4] ss:$8 sps:$4 sm:$0xff]   ;;  %v987_v27 = vld [vmem:[%s1316_s0 + $0xa0] ss:$8 sps:$4 sm:$0xff]   ;;  %v990_v29 = vld [vmem:[%s1316_s0 + $0xb4] ss:$8 sps:$4 sm:$0xff]  }
   0xb   :  { %831 = vmatpush3.bf16.msra.mxu0 %v959_v5  ;;  %948 = vmatpush3.bf16.msra.mxu1 %v959_v5  ;;  %v992_v30 = vld [vmem:[%s1316_s0 + $0x30] ss:$8 sps:$4 sm:$0xff]   ;;  %v994_v32 = vld [vmem:[%s1316_s0 + $0x44] ss:$8 sps:$4 sm:$0xff]   ;;  %v998_v34 = vld [vmem:[%s1316_s0 + $0x40] ss:$8 sps:$4 sm:$0xff]  }
   0xc   :  { %832 = vmatprep.subr.bf16.mxu0 %v960_v6  ;;  %941 = vmatprep.subr.bf16.mxu1 %v960_v6  ;;  %v993_v31 = vld [vmem:[%s1316_s0 + $0xb0] ss:$8 sps:$4 sm:$0xff]   ;;  %v996_v33 = vld [vmem:[%s1316_s0 + $0xc4] ss:$8 sps:$4 sm:$0xff]   ;;  %v999_v35 = vld [vmem:[%s1316_s0 + $0xc0] ss:$8 sps:$4 sm:$0xff]  }
   0xd   :  { %v1000_v36 = vld [vmem:[%s1316_s0 + $0x54] ss:$8 sps:$4 sm:$0xff]   ;;  %v1004_v38 = vld [vmem:[%s1316_s0 + $0x50] ss:$8 sps:$4 sm:$0xff]   ;;  %v1006_v40 = vld [vmem:[%s1316_s0 + $0x64] ss:$8 sps:$4 sm:$0xff]  }
   0xe   :  { %v1002_v37 = vld [vmem:[%s1316_s0 + $0xd4] ss:$8 sps:$4 sm:$0xff]   ;;  %v1005_v39 = vld [vmem:[%s1316_s0 + $0xd0] ss:$8 sps:$4 sm:$0xff]   ;;  %v1008_v41 = vld [vmem:[%s1316_s0 + $0xe4] ss:$8 sps:$4 sm:$0xff]  }
   0xf   :  { %833 = vmatpush3.bf16.msra.mxu0 %v961_v7  ;;  %949 = vmatpush3.bf16.msra.mxu1 %v961_v7  ;;  %v1010_v42 = vld [vmem:[%s1316_s0 + $0x60] ss:$8 sps:$4 sm:$0xff]   ;;  %v1012_v44 = vld [vmem:[%s1316_s0 + $0x74] ss:$8 sps:$4 sm:$0xff]   ;;  %v1016_v46 = vld [vmem:[%s1316_s0 + $0x70] ss:$8 sps:$4 sm:$0xff]  }
  0x10   :  { %834 = vmatprep.subr.bf16.mxu0 %v962_v8  ;;  %942 = vmatprep.subr.bf16.mxu1 %v962_v8  ;;  %v1011_v43 = vld [vmem:[%s1316_s0 + $0xe0] ss:$8 sps:$4 sm:$0xff]   ;;  %v1014_v45 = vld [vmem:[%s1316_s0 + $0xf4] ss:$8 sps:$4 sm:$0xff]   ;;  %v1017_v47 = vld [vmem:[%s1316_s0 + $0xf0] ss:$8 sps:$4 sm:$0xff]  }
  0x11   :  { %v1185_v51 = vld [vmem:[%s1317_s2] ss:$0 sm:$0xff] }
  0x13   :  { %835 = vmatpush3.bf16.msra.mxu0 %v963_v9  ;;  %950 = vmatpush3.bf16.msra.mxu1 %v963_v9 }
  0x14   :  { %836 = vmatprep.subr.bf16.mxu0 %v964_v10  ;;  %943 = vmatprep.subr.bf16.mxu1 %v964_v10 }
  0x17   :  { %837 = vmatpush3.bf16.msra.mxu0 %v965_v13  ;;  %951 = vmatpush3.bf16.msra.mxu1 %v965_v13 }
  0x18   :  { %838 = vmatprep.subr.bf16.mxu0 %v966_v14  ;;  %944 = vmatprep.subr.bf16.mxu1 %v966_v14 }
  0x1b   :  { %839 = vmatpush3.bf16.msra.mxu0 %v967_v15  ;;  %952 = vmatpush3.bf16.msra.mxu1 %v967_v15 }
  0x1c   :  { %840 = vmatprep.subr.bf16.mxu0 %v968_v16  ;;  %945 = vmatprep.subr.bf16.mxu1 %v968_v16 }
  0x1f   :  { %841 = vmatpush3.bf16.msra.mxu0 %v969_v17  ;;  %953 = vmatpush3.bf16.msra.mxu1 %v969_v17 }
  0x22   :  { %441 = vmatmul.mubr.bf16.vlgmr.msra.gmra.mrb[0].mxu0 %v970_v18  ;;  %505 = vmatmul.mubr.bf16.vlgmr.msra.gmra.mrb[0].mxu1 %v973_v19 }
  0x23   :  { %448 = vmatprep.mubr.bf16.mxu0 %v976_v20  ;;  %512 = vmatprep.mubr.bf16.mxu1 %v978_v21 }
  0x2a   :  { %449 = vmatmul.mubr.bf16.gmra.mrb[4].mxu0 %v980_v22  ;;  %513 = vmatmul.mubr.bf16.gmra.mrb[4].mxu1 %v981_v23 }
  0x2b   :  { %456 = vmatprep.mubr.bf16.mxu0 %v982_v24  ;;  %520 = vmatprep.mubr.bf16.mxu1 %v984_v25 }
  0x32   :  { %457 = vmatmul.mubr.bf16.gmra.mrb[8].mxu0 %v986_v26  ;;  %521 = vmatmul.mubr.bf16.gmra.mrb[8].mxu1 %v987_v27 }
  0x33   :  { %464 = vmatprep.mubr.bf16.mxu0 %v988_v28  ;;  %528 = vmatprep.mubr.bf16.mxu1 %v990_v29 }
  0x3a   :  { %465 = vmatmul.mubr.bf16.gmra.mrb[12].mxu0 %v992_v30  ;;  %529 = vmatmul.mubr.bf16.gmra.mrb[12].mxu1 %v993_v31 }
  0x3b   :  { %472 = vmatprep.mubr.bf16.mxu0 %v994_v32  ;;  %536 = vmatprep.mubr.bf16.mxu1 %v996_v33 }
  0x42   :  { %473 = vmatmul.mubr.bf16.gmra.mrb[16].mxu0 %v998_v34  ;;  %537 = vmatmul.mubr.bf16.gmra.mrb[16].mxu1 %v999_v35 }
  0x43   :  { %480 = vmatprep.mubr.bf16.mxu0 %v1000_v36  ;;  %544 = vmatprep.mubr.bf16.mxu1 %v1002_v37 }
  0x4a   :  { %481 = vmatmul.mubr.bf16.gmra.mrb[20].mxu0 %v1004_v38  ;;  %545 = vmatmul.mubr.bf16.gmra.mrb[20].mxu1 %v1005_v39 }
  0x4b   :  { %488 = vmatprep.mubr.bf16.mxu0 %v1006_v40  ;;  %552 = vmatprep.mubr.bf16.mxu1 %v1008_v41 }
  0x52   :  { %489 = vmatmul.mubr.bf16.gmra.mrb[24].mxu0 %v1010_v42  ;;  %553 = vmatmul.mubr.bf16.gmra.mrb[24].mxu1 %v1011_v43 }
  0x53   :  { %496 = vmatprep.mubr.bf16.mxu0 %v1012_v44  ;;  %560 = vmatprep.mubr.bf16.mxu1 %v1014_v45 }
  0x5a   :  { %497 = vmatmul.mubr.bf16.gmra.mrb[28].mxu0 %v1016_v46  ;;  %561 = vmatmul.mubr.bf16.gmra.mrb[28].mxu1 %v1017_v47 }
  0xf5   :  { %v842_v48 = vpop.f32.mrb[0].mxu0  ;;  %v890_v49 = vpop.f32.mrb[0].mxu1 }
  0xf6   :  { %v843_v50 = vpop.f32.mrb[1].mxu0  ;;  %v891_v52 = vpop.f32.mrb[1].mxu1 }
  0xf7   :  { %v844_v53 = vadd.f32 %v843_v50, %v842_v48  ;;  %v892_v54 = vadd.f32 %v891_v52, %v890_v49  ;;  %v845_v55 = vpop.f32.mrb[2].mxu0  ;;  %v893_v56 = vpop.f32.mrb[2].mxu1 }
  0xf8   :  { %v846_v57 = vpop.f32.mrb[3].mxu0  ;;  %v894_v58 = vpop.f32.mrb[3].mxu1 }
  0xf9   :  { %v675_v59 = vadd.f32 %v844_v53, %v1185_v51  ;;  %v691_v60 = vadd.f32 %v892_v54, %v1185_v51  ;;  %v847_v61 = vadd.f32 %v846_v57, %v845_v55  ;;  %v895_v62 = vadd.f32 %v894_v58, %v893_v56 }
  0xfb   :  { %v707_v63 = vmax.f32 %v675_v59, 0.0  ;;  %v723_v0 = vmax.f32 %v691_v60, 0.0  ;;  %v676_v1 = vadd.f32 %v847_v61, %v1185_v51  ;;  %v692_v2 = vadd.f32 %v895_v62, %v1185_v51 }
  0xfd   :  { %739 = vst [vmem:[%s1318_s3] sm:$0xff] %v707_v63  ;;  %755 = vst [vmem:[%s1318_s3 + $0x80] sm:$0xff] %v723_v0  ;;  %v708_v3 = vmax.f32 %v676_v1, 0.0  ;;  %v724_v4 = vmax.f32 %v692_v2, 0.0  ;;  %v848_v5 = vpop.f32.mrb[4].mxu0  ;;  %v896_v6 = vpop.f32.mrb[4].mxu1 }
  0xfe   :  { %v849_v7 = vpop.f32.mrb[5].mxu0  ;;  %v897_v8 = vpop.f32.mrb[5].mxu1 }
  0xff   :  { %740 = vst [vmem:[%s1318_s3 + $0x8] sm:$0xff] %v708_v3  ;;  %756 = vst [vmem:[%s1318_s3 + $0x88] sm:$0xff] %v724_v4  ;;  %v850_v9 = vadd.f32 %v849_v7, %v848_v5  ;;  %v898_v10 = vadd.f32 %v897_v8, %v896_v6  ;;  %v851_v11 = vpop.f32.mrb[6].mxu0  ;;  %v899_v12 = vpop.f32.mrb[6].mxu1 }
 0x100   :  { %v852_v13 = vpop.f32.mrb[7].mxu0  ;;  %v900_v14 = vpop.f32.mrb[7].mxu1 }
 0x101   :  { %v677_v15 = vadd.f32 %v850_v9, %v1185_v51  ;;  %v693_v16 = vadd.f32 %v898_v10, %v1185_v51  ;;  %v853_v17 = vadd.f32 %v852_v13, %v851_v11  ;;  %v901_v18 = vadd.f32 %v900_v14, %v899_v12 }
 0x103   :  { %v709_v19 = vmax.f32 %v677_v15, 0.0  ;;  %v725_v20 = vmax.f32 %v693_v16, 0.0  ;;  %v678_v21 = vadd.f32 %v853_v17, %v1185_v51  ;;  %v694_v22 = vadd.f32 %v901_v18, %v1185_v51 }
 0x105   :  { %741 = vst [vmem:[%s1318_s3 + $0x10] sm:$0xff] %v709_v19  ;;  %757 = vst [vmem:[%s1318_s3 + $0x90] sm:$0xff] %v725_v20  ;;  %v710_v23 = vmax.f32 %v678_v21, 0.0  ;;  %v726_v24 = vmax.f32 %v694_v22, 0.0  ;;  %v854_v25 = vpop.f32.mrb[8].mxu0  ;;  %v902_v26 = vpop.f32.mrb[8].mxu1 }
 0x106   :  { %v855_v27 = vpop.f32.mrb[9].mxu0  ;;  %v903_v28 = vpop.f32.mrb[9].mxu1 }
 0x107   :  { %742 = vst [vmem:[%s1318_s3 + $0x18] sm:$0xff] %v710_v23  ;;  %758 = vst [vmem:[%s1318_s3 + $0x98] sm:$0xff] %v726_v24  ;;  %v856_v29 = vadd.f32 %v855_v27, %v854_v25  ;;  %v904_v30 = vadd.f32 %v903_v28, %v902_v26  ;;  %v857_v31 = vpop.f32.mrb[10].mxu0  ;;  %v905_v32 = vpop.f32.mrb[10].mxu1 }
 0x108   :  { %v858_v33 = vpop.f32.mrb[11].mxu0  ;;  %v906_v34 = vpop.f32.mrb[11].mxu1 }
 0x109   :  { %v679_v35 = vadd.f32 %v856_v29, %v1185_v51  ;;  %v695_v36 = vadd.f32 %v904_v30, %v1185_v51  ;;  %v859_v37 = vadd.f32 %v858_v33, %v857_v31  ;;  %v907_v38 = vadd.f32 %v906_v34, %v905_v32 }
 0x10b   :  { %v711_v39 = vmax.f32 %v679_v35, 0.0  ;;  %v727_v40 = vmax.f32 %v695_v36, 0.0  ;;  %v680_v41 = vadd.f32 %v859_v37, %v1185_v51  ;;  %v696_v42 = vadd.f32 %v907_v38, %v1185_v51 }
 0x10d   :  { %743 = vst [vmem:[%s1318_s3 + $0x20] sm:$0xff] %v711_v39  ;;  %759 = vst [vmem:[%s1318_s3 + $0xa0] sm:$0xff] %v727_v40  ;;  %v712_v43 = vmax.f32 %v680_v41, 0.0  ;;  %v728_v44 = vmax.f32 %v696_v42, 0.0  ;;  %v860_v45 = vpop.f32.mrb[12].mxu0  ;;  %v908_v46 = vpop.f32.mrb[12].mxu1 }
 0x10e   :  { %v861_v47 = vpop.f32.mrb[13].mxu0  ;;  %v909_v48 = vpop.f32.mrb[13].mxu1 }
 0x10f   :  { %744 = vst [vmem:[%s1318_s3 + $0x28] sm:$0xff] %v712_v43  ;;  %760 = vst [vmem:[%s1318_s3 + $0xa8] sm:$0xff] %v728_v44  ;;  %v862_v49 = vadd.f32 %v861_v47, %v860_v45  ;;  %v910_v50 = vadd.f32 %v909_v48, %v908_v46  ;;  %v863_v52 = vpop.f32.mrb[14].mxu0  ;;  %v911_v53 = vpop.f32.mrb[14].mxu1 }
 0x110   :  { %v864_v54 = vpop.f32.mrb[15].mxu0  ;;  %v912_v55 = vpop.f32.mrb[15].mxu1 }
 0x111   :  { %v681_v56 = vadd.f32 %v862_v49, %v1185_v51  ;;  %v697_v57 = vadd.f32 %v910_v50, %v1185_v51  ;;  %v865_v58 = vadd.f32 %v864_v54, %v863_v52  ;;  %v913_v59 = vadd.f32 %v912_v55, %v911_v53 }
 0x113   :  { %v713_v60 = vmax.f32 %v681_v56, 0.0  ;;  %v729_v61 = vmax.f32 %v697_v57, 0.0  ;;  %v682_v62 = vadd.f32 %v865_v58, %v1185_v51  ;;  %v698_v63 = vadd.f32 %v913_v59, %v1185_v51 }
 0x115   :  { %745 = vst [vmem:[%s1318_s3 + $0x30] sm:$0xff] %v713_v60  ;;  %761 = vst [vmem:[%s1318_s3 + $0xb0] sm:$0xff] %v729_v61  ;;  %v714_v0 = vmax.f32 %v682_v62, 0.0  ;;  %v730_v1 = vmax.f32 %v698_v63, 0.0  ;;  %v866_v2 = vpop.f32.mrb[16].mxu0  ;;  %v914_v3 = vpop.f32.mrb[16].mxu1 }
 0x116   :  { %v867_v4 = vpop.f32.mrb[17].mxu0  ;;  %v915_v5 = vpop.f32.mrb[17].mxu1 }
 0x117   :  { %746 = vst [vmem:[%s1318_s3 + $0x38] sm:$0xff] %v714_v0  ;;  %762 = vst [vmem:[%s1318_s3 + $0xb8] sm:$0xff] %v730_v1  ;;  %v868_v6 = vadd.f32 %v867_v4, %v866_v2  ;;  %v916_v7 = vadd.f32 %v915_v5, %v914_v3  ;;  %v869_v8 = vpop.f32.mrb[18].mxu0  ;;  %v917_v9 = vpop.f32.mrb[18].mxu1 }
 0x118   :  { %v870_v10 = vpop.f32.mrb[19].mxu0  ;;  %v918_v11 = vpop.f32.mrb[19].mxu1 }
 0x119   :  { %v683_v12 = vadd.f32 %v868_v6, %v1185_v51  ;;  %v699_v13 = vadd.f32 %v916_v7, %v1185_v51  ;;  %v871_v14 = vadd.f32 %v870_v10, %v869_v8  ;;  %v919_v15 = vadd.f32 %v918_v11, %v917_v9 }
 0x11b   :  { %v715_v16 = vmax.f32 %v683_v12, 0.0  ;;  %v731_v17 = vmax.f32 %v699_v13, 0.0  ;;  %v684_v18 = vadd.f32 %v871_v14, %v1185_v51  ;;  %v700_v19 = vadd.f32 %v919_v15, %v1185_v51 }
 0x11d   :  { %747 = vst [vmem:[%s1318_s3 + $0x40] sm:$0xff] %v715_v16  ;;  %763 = vst [vmem:[%s1318_s3 + $0xc0] sm:$0xff] %v731_v17  ;;  %v716_v20 = vmax.f32 %v684_v18, 0.0  ;;  %v732_v21 = vmax.f32 %v700_v19, 0.0  ;;  %v872_v22 = vpop.f32.mrb[20].mxu0  ;;  %v920_v23 = vpop.f32.mrb[20].mxu1 }
 0x11e   :  { %v873_v24 = vpop.f32.mrb[21].mxu0  ;;  %v921_v25 = vpop.f32.mrb[21].mxu1 }
 0x11f   :  { %748 = vst [vmem:[%s1318_s3 + $0x48] sm:$0xff] %v716_v20  ;;  %764 = vst [vmem:[%s1318_s3 + $0xc8] sm:$0xff] %v732_v21  ;;  %v874_v26 = vadd.f32 %v873_v24, %v872_v22  ;;  %v922_v27 = vadd.f32 %v921_v25, %v920_v23  ;;  %v875_v28 = vpop.f32.mrb[22].mxu0  ;;  %v923_v29 = vpop.f32.mrb[22].mxu1 }
 0x120   :  { %v876_v30 = vpop.f32.mrb[23].mxu0  ;;  %v924_v31 = vpop.f32.mrb[23].mxu1 }
 0x121   :  { %v685_v32 = vadd.f32 %v874_v26, %v1185_v51  ;;  %v701_v33 = vadd.f32 %v922_v27, %v1185_v51  ;;  %v877_v34 = vadd.f32 %v876_v30, %v875_v28  ;;  %v925_v35 = vadd.f32 %v924_v31, %v923_v29 }
 0x123   :  { %v717_v36 = vmax.f32 %v685_v32, 0.0  ;;  %v733_v37 = vmax.f32 %v701_v33, 0.0  ;;  %v686_v38 = vadd.f32 %v877_v34, %v1185_v51  ;;  %v702_v39 = vadd.f32 %v925_v35, %v1185_v51 }
 0x125   :  { %749 = vst [vmem:[%s1318_s3 + $0x50] sm:$0xff] %v717_v36  ;;  %765 = vst [vmem:[%s1318_s3 + $0xd0] sm:$0xff] %v733_v37  ;;  %v718_v40 = vmax.f32 %v686_v38, 0.0  ;;  %v734_v41 = vmax.f32 %v702_v39, 0.0  ;;  %v878_v42 = vpop.f32.mrb[24].mxu0  ;;  %v926_v43 = vpop.f32.mrb[24].mxu1 }
 0x126   :  { %v879_v44 = vpop.f32.mrb[25].mxu0  ;;  %v927_v45 = vpop.f32.mrb[25].mxu1 }
 0x127   :  { %750 = vst [vmem:[%s1318_s3 + $0x58] sm:$0xff] %v718_v40  ;;  %766 = vst [vmem:[%s1318_s3 + $0xd8] sm:$0xff] %v734_v41  ;;  %v880_v46 = vadd.f32 %v879_v44, %v878_v42  ;;  %v928_v47 = vadd.f32 %v927_v45, %v926_v43  ;;  %v881_v48 = vpop.f32.mrb[26].mxu0  ;;  %v929_v49 = vpop.f32.mrb[26].mxu1 }
 0x128   :  { %v882_v50 = vpop.f32.mrb[27].mxu0  ;;  %v930_v52 = vpop.f32.mrb[27].mxu1 }
 0x129   :  { %v687_v53 = vadd.f32 %v880_v46, %v1185_v51  ;;  %v703_v54 = vadd.f32 %v928_v47, %v1185_v51  ;;  %v883_v55 = vadd.f32 %v882_v50, %v881_v48  ;;  %v931_v56 = vadd.f32 %v930_v52, %v929_v49 }
 0x12b   :  { %v719_v57 = vmax.f32 %v687_v53, 0.0  ;;  %v735_v58 = vmax.f32 %v703_v54, 0.0  ;;  %v688_v59 = vadd.f32 %v883_v55, %v1185_v51  ;;  %v704_v60 = vadd.f32 %v931_v56, %v1185_v51 }
 0x12d   :  { %751 = vst [vmem:[%s1318_s3 + $0x60] sm:$0xff] %v719_v57  ;;  %767 = vst [vmem:[%s1318_s3 + $0xe0] sm:$0xff] %v735_v58  ;;  %v720_v61 = vmax.f32 %v688_v59, 0.0  ;;  %v736_v62 = vmax.f32 %v704_v60, 0.0  ;;  %v884_v63 = vpop.f32.mrb[28].mxu0  ;;  %v932_v0 = vpop.f32.mrb[28].mxu1 }
 0x12e   :  { %v885_v1 = vpop.f32.mrb[29].mxu0  ;;  %v933_v2 = vpop.f32.mrb[29].mxu1 }
 0x12f   :  { %752 = vst [vmem:[%s1318_s3 + $0x68] sm:$0xff] %v720_v61  ;;  %768 = vst [vmem:[%s1318_s3 + $0xe8] sm:$0xff] %v736_v62  ;;  %v886_v3 = vadd.f32 %v885_v1, %v884_v63  ;;  %v934_v4 = vadd.f32 %v933_v2, %v932_v0  ;;  %v887_v5 = vpop.f32.mrb[30].mxu0  ;;  %v935_v6 = vpop.f32.mrb[30].mxu1 }
 0x130   :  { %v888_v7 = vpop.f32.mrb[31].mxu0  ;;  %v936_v8 = vpop.f32.mrb[31].mxu1 }
 0x131   :  { %v689_v9 = vadd.f32 %v886_v3, %v1185_v51  ;;  %v705_v10 = vadd.f32 %v934_v4, %v1185_v51  ;;  %v889_v11 = vadd.f32 %v888_v7, %v887_v5  ;;  %v937_v12 = vadd.f32 %v936_v8, %v935_v6 }
 0x133   :  { %v721_v13 = vmax.f32 %v689_v9, 0.0  ;;  %v737_v14 = vmax.f32 %v705_v10, 0.0  ;;  %v690_v15 = vadd.f32 %v889_v11, %v1185_v51  ;;  %v706_v16 = vadd.f32 %v937_v12, %v1185_v51 }
 0x135   :  { %753 = vst [vmem:[%s1318_s3 + $0x70] sm:$0xff] %v721_v13  ;;  %769 = vst [vmem:[%s1318_s3 + $0xf0] sm:$0xff] %v737_v14  ;;  %v722_v17 = vmax.f32 %v690_v15, 0.0  ;;  %v738_v18 = vmax.f32 %v706_v16, 0.0 }
 0x137   :  { %754 = vst [vmem:[%s1318_s3 + $0x78] sm:$0xff] %v722_v17  ;;  %770 = vst [vmem:[%s1318_s3 + $0xf8] sm:$0xff] %v738_v18 }

// kernel: attribute_decoder.4
= control target key start
LH: loop header
LB: loop body
LE: loop exit
PB: predicated region body
PF: predicated region fallthrough
CT: control target
= control target key end

     0   :  { %s1927_s1 = inlined_call_operand.vmem [shape: bf16[256,128], index: 1, kind: input, shape index: {}]   ;;  %s1928_s0 = inlined_call_operand.vmem [shape: bf16[256,256], index: 0, kind: input, shape index: {}]   ;;  %s1929_s3 = inlined_call_operand.vmem [shape: bf16[128,128], index: 3, kind: input, shape index: {}]   ;;  %s1930_s2 = inlined_call_operand.vmem [shape: f32[1,128], index: 2, kind: input, shape index: {}]   ;;  %s1931_s4 = inlined_call_operand.vmem [shape: bf16[256,128], index: 4, kind: output, shape index: {}]  }
   0x1   :  { %v1565_v0 = vld [vmem:[%s1927_s1 + $0x40] sm:$0xff]   ;;  %v1567_v2 = vld [vmem:[%s1927_s1 + $0x48] sm:$0xff]   ;;  %v1569_v4 = vld [vmem:[%s1927_s1 + $0x50] sm:$0xff]  }
   0x2   :  { %v1566_v1 = vld [vmem:[%s1927_s1] sm:$0xff]   ;;  %1365 = vmatprep.subr.bf16.mxu0 %v1565_v0  ;;  %1549 = vmatprep.subr.bf16.mxu1 %v1565_v0  ;;  %v1568_v3 = vld [vmem:[%s1927_s1 + $0x8] sm:$0xff]   ;;  %v1570_v5 = vld [vmem:[%s1927_s1 + $0x10] sm:$0xff]  }
   0x3   :  { %1366 = vmatpush3.bf16.msra.mxu0 %v1566_v1  ;;  %1557 = vmatpush3.bf16.msra.mxu1 %v1566_v1  ;;  %v1571_v6 = vld [vmem:[%s1927_s1 + $0x58] sm:$0xff]   ;;  %v1573_v8 = vld [vmem:[%s1927_s1 + $0x60] sm:$0xff]   ;;  %v1575_v10 = vld [vmem:[%s1927_s1 + $0x68] sm:$0xff]  }
   0x4   :  { %1367 = vmatprep.subr.bf16.mxu0 %v1567_v2  ;;  %1550 = vmatprep.subr.bf16.mxu1 %v1567_v2  ;;  %v1572_v7 = vld [vmem:[%s1927_s1 + $0x18] sm:$0xff]   ;;  %v1574_v9 = vld [vmem:[%s1927_s1 + $0x20] sm:$0xff]   ;;  %v1576_v12 = vld [vmem:[%s1927_s1 + $0x28] sm:$0xff]  }
   0x5   :  { %v1583_v11 = vld [vmem:[%s1928_s0 + $0x4] ss:$8 sps:$4 sm:$0xff]   ;;  %v1577_v13 = vld [vmem:[%s1927_s1 + $0x70] sm:$0xff]   ;;  %v1579_v15 = vld [vmem:[%s1927_s1 + $0x78] sm:$0xff]  }
   0x6   :  { %443 = vmatprep.mubr.bf16.mxu0 %v1583_v11  ;;  %v1578_v14 = vld [vmem:[%s1927_s1 + $0x30] sm:$0xff]   ;;  %v1580_v16 = vld [vmem:[%s1927_s1 + $0x38] sm:$0xff]   ;;  %v1581_v17 = vld [vmem:[%s1928_s0] ss:$8 sps:$4 sm:$0xff]  }
   0x7   :  { %1368 = vmatpush3.bf16.msra.mxu0 %v1568_v3  ;;  %1558 = vmatpush3.bf16.msra.mxu1 %v1568_v3  ;;  %v1613_v18 = vld [vmem:[%s1928_s0 + $0xc4] ss:$8 sps:$4 sm:$0xff]   ;;  %v1584_v19 = vld [vmem:[%s1928_s0 + $0x14] ss:$8 sps:$4 sm:$0xff]   ;;  %v1611_v20 = vld [vmem:[%s1928_s0 + $0xc0] ss:$8 sps:$4 sm:$0xff]  }
   0x8   :  { %1369 = vmatprep.subr.bf16.mxu0 %v1569_v4  ;;  %1551 = vmatprep.subr.bf16.mxu1 %v1569_v4  ;;  %v1617_v21 = vld [vmem:[%s1928_s0 + $0xd4] ss:$8 sps:$4 sm:$0xff]   ;;  %v1586_v22 = vld [vmem:[%s1928_s0 + $0x10] ss:$8 sps:$4 sm:$0xff]   ;;  %v1587_v23 = vld [vmem:[%s1928_s0 + $0x24] ss:$8 sps:$4 sm:$0xff]  }
   0x9   :  { %539 = vmatprep.mubr.bf16.mxu1 %v1613_v18  ;;  %v1619_v24 = vld [vmem:[%s1928_s0 + $0xd0] ss:$8 sps:$4 sm:$0xff]   ;;  %v1623_v25 = vld [vmem:[%s1928_s0 + $0xe4] ss:$8 sps:$4 sm:$0xff]   ;;  %v1589_v29 = vld [vmem:[%s1928_s0 + $0x20] ss:$8 sps:$4 sm:$0xff]  }
   0xa   :  { %v1629_v26 = vld [vmem:[%s1929_s3] sm:$0xff]   ;;  %v1630_v27 = vld [vmem:[%s1929_s3 + $0x8] sm:$0xff]   ;;  %v1631_v28 = vld [vmem:[%s1929_s3 + $0x10] sm:$0xff]  }
   0xb   :  { %1370 = vmatpush3.bf16.msra.mxu0 %v1570_v5  ;;  %1559 = vmatpush3.bf16.msra.mxu1 %v1570_v5  ;;  %v1590_v30 = vld [vmem:[%s1928_s0 + $0x34] ss:$8 sps:$4 sm:$0xff]   ;;  %v1625_v31 = vld [vmem:[%s1928_s0 + $0xe0] ss:$8 sps:$4 sm:$0xff]   ;;  %v1592_v33 = vld [vmem:[%s1928_s0 + $0x30] ss:$8 sps:$4 sm:$0xff]  }
   0xc   :  { %1371 = vmatprep.subr.bf16.mxu0 %v1571_v6  ;;  %1552 = vmatprep.subr.bf16.mxu1 %v1571_v6  ;;  %v1626_v32 = vld [vmem:[%s1928_s0 + $0xf4] ss:$8 sps:$4 sm:$0xff]   ;;  %v1593_v34 = vld [vmem:[%s1928_s0 + $0x44] ss:$8 sps:$4 sm:$0xff]   ;;  %v1628_v35 = vld [vmem:[%s1928_s0 + $0xf0] ss:$8 sps:$4 sm:$0xff]  }
   0xd   :  { %v1595_v36 = vld [vmem:[%s1928_s0 + $0x40] ss:$8 sps:$4 sm:$0xff]   ;;  %v1596_v37 = vld [vmem:[%s1928_s0 + $0x54] ss:$8 sps:$4 sm:$0xff]   ;;  %v1598_v38 = vld [vmem:[%s1928_s0 + $0x50] ss:$8 sps:$4 sm:$0xff]  }
   0xe   :  { %v1599_v39 = vld [vmem:[%s1928_s0 + $0x64] ss:$8 sps:$4 sm:$0xff]   ;;  %v1601_v40 = vld [vmem:[%s1928_s0 + $0x60] ss:$8 sps:$4 sm:$0xff]   ;;  %v1602_v41 = vld [vmem:[%s1928_s0 + $0x74] ss:$8 sps:$4 sm:$0xff]  }
   0xf   :  { %1372 = vmatpush3.bf16.msra.mxu0 %v1572_v7  ;;  %1560 = vmatpush3.bf16.msra.mxu1 %v1572_v7  ;;  %v1604_v42 = vld [vmem:[%s1928_s0 + $0x70] ss:$8 sps:$4 sm:$0xff]   ;;  %v1605_v43 = vld [vmem:[%s1928_s0 + $0x84] ss:$8 sps:$4 sm:$0xff]   ;;  %v1607_v44 = vld [vmem:[%s1928_s0 + $0x80] ss:$8 sps:$4 sm:$0xff]  }
  0x10   :  { %1373 = vmatprep.subr.bf16.mxu0 %v1573_v8  ;;  %1553 = vmatprep.subr.bf16.mxu1 %v1573_v8  ;;  %v1608_v45 = vld [vmem:[%s1928_s0 + $0x94] ss:$8 sps:$4 sm:$0xff]   ;;  %v1610_v46 = vld [vmem:[%s1928_s0 + $0x90] ss:$8 sps:$4 sm:$0xff]   ;;  %v1614_v47 = vld [vmem:[%s1928_s0 + $0xa4] ss:$8 sps:$4 sm:$0xff]  }
  0x11   :  { %v1616_v48 = vld [vmem:[%s1928_s0 + $0xa0] ss:$8 sps:$4 sm:$0xff]   ;;  %v1620_v49 = vld [vmem:[%s1928_s0 + $0xb4] ss:$8 sps:$4 sm:$0xff]   ;;  %v1622_v51 = vld [vmem:[%s1928_s0 + $0xb0] ss:$8 sps:$4 sm:$0xff]  }
  0x12   :  { %v1632_v50 = vld [vmem:[%s1929_s3 + $0x18] sm:$0xff]   ;;  %v1633_v52 = vld [vmem:[%s1929_s3 + $0x20] sm:$0xff]   ;;  %v1634_v53 = vld [vmem:[%s1929_s3 + $0x28] sm:$0xff]  }
  0x13   :  { %1374 = vmatpush3.bf16.msra.mxu0 %v1574_v9  ;;  %1561 = vmatpush3.bf16.msra.mxu1 %v1574_v9  ;;  %v1635_v54 = vld [vmem:[%s1929_s3 + $0x30] sm:$0xff]   ;;  %v1636_v55 = vld [vmem:[%s1929_s3 + $0x38] sm:$0xff]   ;;  %v1833_v58 = vld [vmem:[%s1930_s2] ss:$0 sm:$0xff] }
  0x14   :  { %1375 = vmatprep.subr.bf16.mxu0 %v1575_v10  ;;  %1554 = vmatprep.subr.bf16.mxu1 %v1575_v10 }
  0x17   :  { %1376 = vmatpush3.bf16.msra.mxu0 %v1576_v12  ;;  %1562 = vmatpush3.bf16.msra.mxu1 %v1576_v12 }
  0x18   :  { %1377 = vmatprep.subr.bf16.mxu0 %v1577_v13  ;;  %1555 = vmatprep.subr.bf16.mxu1 %v1577_v13 }
  0x1b   :  { %1378 = vmatpush3.bf16.msra.mxu0 %v1578_v14  ;;  %1563 = vmatpush3.bf16.msra.mxu1 %v1578_v14 }
  0x1c   :  { %1379 = vmatprep.subr.bf16.mxu0 %v1579_v15  ;;  %1556 = vmatprep.subr.bf16.mxu1 %v1579_v15 }
  0x1f   :  { %1380 = vmatpush3.bf16.msra.mxu0 %v1580_v16  ;;  %1564 = vmatpush3.bf16.msra.mxu1 %v1580_v16 }
  0x20   :  { %1501 = vmatprep.subr.bf16.mxu1 %v1629_v26 }
  0x22   :  { %444 = vmatmul.mubr.bf16.vlgmr.msra.gmra.mrb[0].mxu0 %v1581_v17  ;;  %540 = vmatmul.mubr.bf16.vlgmr.msra.gmra.mrb[0].mxu1 %v1611_v20 }
  0x23   :  { %451 = vmatprep.mubr.bf16.mxu0 %v1584_v19  ;;  %547 = vmatprep.mubr.bf16.mxu1 %v1617_v21 }
  0x24   :  { %1502 = vmatpush3.bf16.msra.mxu1 %v1629_v26 }
  0x25   :  { %1503 = vmatprep.subr.bf16.mxu1 %v1630_v27 }
  0x28   :  { %1504 = vmatpush3.bf16.msra.mxu1 %v1630_v27 }
  0x29   :  { %1505 = vmatprep.subr.bf16.mxu1 %v1631_v28 }
  0x2a   :  { %452 = vmatmul.mubr.bf16.gmra.mrb[4].mxu0 %v1586_v22  ;;  %548 = vmatmul.mubr.bf16.gmra.mrb[4].mxu1 %v1619_v24 }
  0x2b   :  { %459 = vmatprep.mubr.bf16.mxu0 %v1587_v23  ;;  %555 = vmatprep.mubr.bf16.mxu1 %v1623_v25 }
  0x2c   :  { %1506 = vmatpush3.bf16.msra.mxu1 %v1631_v28 }
  0x2d   :  { %1507 = vmatprep.subr.bf16.mxu1 %v1632_v50 }
  0x30   :  { %1508 = vmatpush3.bf16.msra.mxu1 %v1632_v50 }
  0x31   :  { %1509 = vmatprep.subr.bf16.mxu1 %v1633_v52 }
  0x32   :  { %460 = vmatmul.mubr.bf16.gmra.mrb[8].mxu0 %v1589_v29  ;;  %556 = vmatmul.mubr.bf16.gmra.mrb[8].mxu1 %v1625_v31 }
  0x33   :  { %467 = vmatprep.mubr.bf16.mxu0 %v1590_v30  ;;  %563 = vmatprep.mubr.bf16.mxu1 %v1626_v32 }
  0x34   :  { %1510 = vmatpush3.bf16.msra.mxu1 %v1633_v52 }
  0x35   :  { %1511 = vmatprep.subr.bf16.mxu1 %v1634_v53 }
  0x38   :  { %1512 = vmatpush3.bf16.msra.mxu1 %v1634_v53 }
  0x39   :  { %1513 = vmatprep.subr.bf16.mxu1 %v1635_v54 }
  0x3a   :  { %468 = vmatmul.mubr.bf16.gmra.mrb[12].mxu0 %v1592_v33  ;;  %564 = vmatmul.mubr.bf16.gmra.mrb[12].mxu1 %v1628_v35 }
  0x3b   :  { %475 = vmatprep.mubr.bf16.mxu0 %v1593_v34 }
  0x3c   :  { %1514 = vmatpush3.bf16.msra.mxu1 %v1635_v54 }
  0x3d   :  { %1515 = vmatprep.subr.bf16.mxu1 %v1636_v55 }
  0x40   :  { %1516 = vmatpush3.bf16.msra.mxu1 %v1636_v55 }
  0x42   :  { %476 = vmatmul.mubr.bf16.gmra.mrb[16].mxu0 %v1595_v36 }
  0x43   :  { %483 = vmatprep.mubr.bf16.mxu0 %v1596_v37 }
  0x4a   :  { %484 = vmatmul.mubr.bf16.gmra.mrb[20].mxu0 %v1598_v38 }
  0x4b   :  { %491 = vmatprep.mubr.bf16.mxu0 %v1599_v39 }
  0x52   :  { %492 = vmatmul.mubr.bf16.gmra.mrb[24].mxu0 %v1601_v40 }
  0x53   :  { %499 = vmatprep.mubr.bf16.mxu0 %v1602_v41 }
  0x5a   :  { %500 = vmatmul.mubr.bf16.gmra.mrb[28].mxu0 %v1604_v42 }
  0x5b   :  { %507 = vmatprep.mubr.bf16.mxu0 %v1605_v43 }
  0x62   :  { %508 = vmatmul.mubr.bf16.gmra.mrb[32].mxu0 %v1607_v44 }
  0x63   :  { %515 = vmatprep.mubr.bf16.mxu0 %v1608_v45 }
  0x6a   :  { %516 = vmatmul.mubr.bf16.gmra.mrb[36].mxu0 %v1610_v46 }
  0x6b   :  { %523 = vmatprep.mubr.bf16.mxu0 %v1614_v47 }
  0x72   :  { %524 = vmatmul.mubr.bf16.gmra.mrb[40].mxu0 %v1616_v48 }
  0x73   :  { %531 = vmatprep.mubr.bf16.mxu0 %v1620_v49 }
  0x7a   :  { %532 = vmatmul.mubr.bf16.gmra.mrb[44].mxu0 %v1622_v51 }
  0xf5   :  { %v1381_v56 = vpop.f32.mrb[0].mxu0  ;;  %v1453_v59 = vpop.f32.mrb[0].mxu1 }
  0xf6   :  { %v1382_v57 = vpop.f32.mrb[1].mxu0  ;;  %v1454_v62 = vpop.f32.mrb[1].mxu1 }
  0xf7   :  { %v1383_v60 = vadd.f32 %v1382_v57, %v1381_v56  ;;  %v1384_v61 = vpop.f32.mrb[2].mxu0  ;;  %v1455_v0 = vadd.f32 %v1454_v62, %v1453_v59  ;;  %v1456_v1 = vpop.f32.mrb[2].mxu1 }
  0xf8   :  { %v1385_v63 = vpop.f32.mrb[3].mxu0  ;;  %v1457_v4 = vpop.f32.mrb[3].mxu1 }
  0xf9   :  { %v678_v2 = vadd.f32 %v1383_v60, %v1833_v58  ;;  %v1386_v3 = vadd.f32 %v1385_v63, %v1384_v61  ;;  %v702_v5 = vadd.f32 %v1455_v0, %v1833_v58  ;;  %v1458_v6 = vadd.f32 %v1457_v4, %v1456_v1 }
  0xfb   :  { %v679_v7 = vadd.f32 %v1386_v3, %v1833_v58  ;;  %v734_v8 = vmax.f32 %v702_v5, 0.0  ;;  %v703_v9 = vadd.f32 %v1458_v6, %v1833_v58  ;;  %v710_v10 = vmax.f32 %v678_v2, 0.0 }
  0xfd   :  { %v711_v11 = vmax.f32 %v679_v7, 0.0  ;;  %v1387_v12 = vpop.f32.mrb[4].mxu0  ;;  %v735_v14 = vmax.f32 %v703_v9, 0.0  ;;  %v1459_v15 = vpop.f32.mrb[4].mxu1 }
  0xfe   :  { %v1388_v13 = vpop.f32.mrb[5].mxu0  ;;  %v1460_v19 = vpop.f32.mrb[5].mxu1 }
  0xff   :  { %v1389_v16 = vadd.f32 %v1388_v13, %v1387_v12  ;;  %v1390_v17 = vpop.f32.mrb[6].mxu0  ;;  %v742_v18 = vpack.c.bf16 %v711_v11, %v710_v10  ;;  %v1461_v21 = vadd.f32 %v1460_v19, %v1459_v15  ;;  %v1462_v22 = vpop.f32.mrb[6].mxu1  ;;  %v1839_v23 = vpack.c.bf16 %v735_v14, %v734_v8 }
 0x100   :  { %v1391_v20 = vpop.f32.mrb[7].mxu0  ;;  %v1463_v26 = vpop.f32.mrb[7].mxu1 }
 0x101   :  { %v680_v24 = vadd.f32 %v1389_v16, %v1833_v58  ;;  %v1392_v25 = vadd.f32 %v1391_v20, %v1390_v17  ;;  %1517 = vmatprep.mubr.bf16.mxu1 %v742_v18  ;;  %v704_v27 = vadd.f32 %v1461_v21, %v1833_v58  ;;  %v1464_v28 = vadd.f32 %v1463_v26, %v1462_v22 }
 0x103   :  { %v681_v29 = vadd.f32 %v1392_v25, %v1833_v58  ;;  %v736_v30 = vmax.f32 %v704_v27, 0.0  ;;  %v705_v31 = vadd.f32 %v1464_v28, %v1833_v58  ;;  %v712_v32 = vmax.f32 %v680_v24, 0.0 }
 0x105   :  { %v713_v33 = vmax.f32 %v681_v29, 0.0  ;;  %v1393_v34 = vpop.f32.mrb[8].mxu0  ;;  %v737_v36 = vmax.f32 %v705_v31, 0.0  ;;  %v1465_v37 = vpop.f32.mrb[8].mxu1 }
 0x106   :  { %v1394_v35 = vpop.f32.mrb[9].mxu0  ;;  %v1466_v41 = vpop.f32.mrb[9].mxu1 }
 0x107   :  { %v743_v38 = vpack.c.bf16 %v713_v33, %v712_v32  ;;  %v1395_v39 = vadd.f32 %v1394_v35, %v1393_v34  ;;  %v1396_v40 = vpop.f32.mrb[10].mxu0  ;;  %v1467_v43 = vadd.f32 %v1466_v41, %v1465_v37  ;;  %v1468_v44 = vpop.f32.mrb[10].mxu1  ;;  %v1845_v45 = vpack.c.bf16 %v737_v36, %v736_v30 }
 0x108   :  { %v1397_v42 = vpop.f32.mrb[11].mxu0  ;;  %v1469_v48 = vpop.f32.mrb[11].mxu1 }
 0x109   :  { %v682_v46 = vadd.f32 %v1395_v39, %v1833_v58  ;;  %v1398_v47 = vadd.f32 %v1397_v42, %v1396_v40  ;;  %1518 = vmatmul.mubr.bf16.vlgmr.msra.gmra.mrb[16].mxu1 %v743_v38  ;;  %v706_v49 = vadd.f32 %v1467_v43, %v1833_v58  ;;  %v1470_v50 = vadd.f32 %v1469_v48, %v1468_v44 }
 0x10b   :  { %v683_v51 = vadd.f32 %v1398_v47, %v1833_v58  ;;  %v738_v52 = vmax.f32 %v706_v49, 0.0  ;;  %v707_v53 = vadd.f32 %v1470_v50, %v1833_v58  ;;  %v714_v54 = vmax.f32 %v682_v46, 0.0 }
 0x10d   :  { %v715_v55 = vmax.f32 %v683_v51, 0.0  ;;  %v1399_v56 = vpop.f32.mrb[12].mxu0  ;;  %v739_v59 = vmax.f32 %v707_v53, 0.0  ;;  %v1471_v60 = vpop.f32.mrb[12].mxu1 }
 0x10e   :  { %v1400_v57 = vpop.f32.mrb[13].mxu0  ;;  %v1472_v0 = vpop.f32.mrb[13].mxu1 }
 0x10f   :  { %v1401_v61 = vadd.f32 %v1400_v57, %v1399_v56  ;;  %v1402_v62 = vpop.f32.mrb[14].mxu0  ;;  %v744_v63 = vpack.c.bf16 %v715_v55, %v714_v54  ;;  %v1473_v2 = vadd.f32 %v1472_v0, %v1471_v60  ;;  %v1474_v3 = vpop.f32.mrb[14].mxu1  ;;  %v1851_v4 = vpack.c.bf16 %v739_v59, %v738_v52 }
 0x110   :  { %v1403_v1 = vpop.f32.mrb[15].mxu0  ;;  %v1475_v7 = vpop.f32.mrb[15].mxu1 }
 0x111   :  { %v684_v5 = vadd.f32 %v1401_v61, %v1833_v58  ;;  %v1404_v6 = vadd.f32 %v1403_v1, %v1402_v62  ;;  %1521 = vmatprep.mubr.bf16.mxu1 %v744_v63  ;;  %v708_v8 = vadd.f32 %v1473_v2, %v1833_v58  ;;  %v1476_v9 = vadd.f32 %v1475_v7, %v1474_v3 }
 0x113   :  { %v685_v10 = vadd.f32 %v1404_v6, %v1833_v58  ;;  %v740_v11 = vmax.f32 %v708_v8, 0.0  ;;  %v709_v12 = vadd.f32 %v1476_v9, %v1833_v58  ;;  %v716_v13 = vmax.f32 %v684_v5, 0.0 }
 0x115   :  { %v717_v14 = vmax.f32 %v685_v10, 0.0  ;;  %v1405_v15 = vpop.f32.mrb[16].mxu0  ;;  %v741_v17 = vmax.f32 %v709_v12, 0.0 }
 0x116   :  { %v1406_v16 = vpop.f32.mrb[17].mxu0 }
 0x117   :  { %v1407_v18 = vadd.f32 %v1406_v16, %v1405_v15  ;;  %v1408_v19 = vpop.f32.mrb[18].mxu0  ;;  %v745_v20 = vpack.c.bf16 %v717_v14, %v716_v13  ;;  %v1857_v22 = vpack.c.bf16 %v741_v17, %v740_v11 }
 0x118   :  { %v1409_v21 = vpop.f32.mrb[19].mxu0 }
 0x119   :  { %v686_v24 = vadd.f32 %v1407_v18, %v1833_v58  ;;  %v1410_v25 = vadd.f32 %v1409_v21, %v1408_v19  ;;  %1522 = vmatmul.mubr.bf16.gmra.mrb[20].mxu1 %v745_v20 }
 0x11b   :  { %v687_v26 = vadd.f32 %v1410_v25, %v1833_v58  ;;  %v718_v27 = vmax.f32 %v686_v24, 0.0 }
 0x11d   :  { %v719_v28 = vmax.f32 %v687_v26, 0.0  ;;  %v1411_v29 = vpop.f32.mrb[20].mxu0 }
 0x11e   :  { %v1412_v30 = vpop.f32.mrb[21].mxu0 }
 0x11f   :  { %v1413_v31 = vadd.f32 %v1412_v30, %v1411_v29  ;;  %v1414_v32 = vpop.f32.mrb[22].mxu0  ;;  %v746_v33 = vpack.c.bf16 %v719_v28, %v718_v27 }
 0x120   :  { %v1415_v34 = vpop.f32.mrb[23].mxu0 }
 0x121   :  { %v688_v35 = vadd.f32 %v1413_v31, %v1833_v58  ;;  %v1416_v36 = vadd.f32 %v1415_v34, %v1414_v32  ;;  %1525 = vmatprep.mubr.bf16.mxu1 %v746_v33 }
 0x123   :  { %v689_v37 = vadd.f32 %v1416_v36, %v1833_v58  ;;  %v720_v38 = vmax.f32 %v688_v35, 0.0 }
 0x125   :  { %v721_v39 = vmax.f32 %v689_v37, 0.0  ;;  %v1417_v40 = vpop.f32.mrb[24].mxu0 }
 0x126   :  { %v1418_v41 = vpop.f32.mrb[25].mxu0 }
 0x127   :  { %v1419_v42 = vadd.f32 %v1418_v41, %v1417_v40  ;;  %v1420_v43 = vpop.f32.mrb[26].mxu0  ;;  %v747_v44 = vpack.c.bf16 %v721_v39, %v720_v38 }
 0x128   :  { %v1421_v46 = vpop.f32.mrb[27].mxu0 }
 0x129   :  { %v690_v47 = vadd.f32 %v1419_v42, %v1833_v58  ;;  %v1422_v48 = vadd.f32 %v1421_v46, %v1420_v43  ;;  %1526 = vmatmul.mubr.bf16.gmra.mrb[24].mxu1 %v747_v44 }
 0x12b   :  { %v691_v49 = vadd.f32 %v1422_v48, %v1833_v58  ;;  %v722_v50 = vmax.f32 %v690_v47, 0.0 }
 0x12d   :  { %v723_v51 = vmax.f32 %v691_v49, 0.0  ;;  %v1423_v52 = vpop.f32.mrb[28].mxu0 }
 0x12e   :  { %v1424_v53 = vpop.f32.mrb[29].mxu0 }
 0x12f   :  { %v1425_v54 = vadd.f32 %v1424_v53, %v1423_v52  ;;  %v1426_v55 = vpop.f32.mrb[30].mxu0  ;;  %v748_v56 = vpack.c.bf16 %v723_v51, %v722_v50 }
 0x130   :  { %v1427_v57 = vpop.f32.mrb[31].mxu0 }
 0x131   :  { %v692_v59 = vadd.f32 %v1425_v54, %v1833_v58  ;;  %v1428_v60 = vadd.f32 %v1427_v57, %v1426_v55  ;;  %1529 = vmatprep.mubr.bf16.mxu1 %v748_v56 }
 0x133   :  { %v693_v61 = vadd.f32 %v1428_v60, %v1833_v58  ;;  %v724_v62 = vmax.f32 %v692_v59, 0.0 }
 0x135   :  { %v725_v63 = vmax.f32 %v693_v61, 0.0  ;;  %v1429_v0 = vpop.f32.mrb[32].mxu0 }
 0x136   :  { %v1430_v1 = vpop.f32.mrb[33].mxu0 }
 0x137   :  { %v1431_v2 = vadd.f32 %v1430_v1, %v1429_v0  ;;  %v1432_v3 = vpop.f32.mrb[34].mxu0  ;;  %v749_v5 = vpack.c.bf16 %v725_v63, %v724_v62 }
 0x138   :  { %v1433_v6 = vpop.f32.mrb[35].mxu0 }
 0x139   :  { %v694_v7 = vadd.f32 %v1431_v2, %v1833_v58  ;;  %v1434_v8 = vadd.f32 %v1433_v6, %v1432_v3  ;;  %1530 = vmatmul.mubr.bf16.gmra.mrb[28].mxu1 %v749_v5 }
 0x13b   :  { %v695_v9 = vadd.f32 %v1434_v8, %v1833_v58  ;;  %v726_v10 = vmax.f32 %v694_v7, 0.0 }
 0x13d   :  { %v727_v11 = vmax.f32 %v695_v9, 0.0  ;;  %v1435_v12 = vpop.f32.mrb[36].mxu0 }
 0x13e   :  { %v1436_v13 = vpop.f32.mrb[37].mxu0 }
 0x13f   :  { %v1437_v14 = vadd.f32 %v1436_v13, %v1435_v12  ;;  %v1438_v15 = vpop.f32.mrb[38].mxu0  ;;  %v750_v16 = vpack.c.bf16 %v727_v11, %v726_v10 }
 0x140   :  { %v1439_v17 = vpop.f32.mrb[39].mxu0 }
 0x141   :  { %v696_v18 = vadd.f32 %v1437_v14, %v1833_v58  ;;  %v1440_v19 = vadd.f32 %v1439_v17, %v1438_v15  ;;  %1533 = vmatprep.mubr.bf16.mxu1 %v750_v16 }
 0x143   :  { %v697_v20 = vadd.f32 %v1440_v19, %v1833_v58  ;;  %v728_v21 = vmax.f32 %v696_v18, 0.0 }
 0x145   :  { %v729_v24 = vmax.f32 %v697_v20, 0.0  ;;  %v1441_v25 = vpop.f32.mrb[40].mxu0 }
 0x146   :  { %v1442_v26 = vpop.f32.mrb[41].mxu0 }
 0x147   :  { %v1443_v27 = vadd.f32 %v1442_v26, %v1441_v25  ;;  %v1444_v28 = vpop.f32.mrb[42].mxu0  ;;  %v751_v29 = vpack.c.bf16 %v729_v24, %v728_v21 }
 0x148   :  { %v1445_v30 = vpop.f32.mrb[43].mxu0 }
 0x149   :  { %v698_v31 = vadd.f32 %v1443_v27, %v1833_v58  ;;  %v1446_v32 = vadd.f32 %v1445_v30, %v1444_v28  ;;  %1534 = vmatmul.mubr.bf16.gmra.mrb[32].mxu1 %v751_v29 }
 0x14b   :  { %v699_v33 = vadd.f32 %v1446_v32, %v1833_v58  ;;  %v730_v34 = vmax.f32 %v698_v31, 0.0 }
 0x14d   :  { %v731_v35 = vmax.f32 %v699_v33, 0.0  ;;  %v1447_v36 = vpop.f32.mrb[44].mxu0 }
 0x14e   :  { %v1448_v37 = vpop.f32.mrb[45].mxu0 }
 0x14f   :  { %v1449_v38 = vadd.f32 %v1448_v37, %v1447_v36  ;;  %v1450_v39 = vpop.f32.mrb[46].mxu0  ;;  %v752_v40 = vpack.c.bf16 %v731_v35, %v730_v34 }
 0x150   :  { %v1451_v41 = vpop.f32.mrb[47].mxu0 }
 0x151   :  { %v700_v42 = vadd.f32 %v1449_v38, %v1833_v58  ;;  %v1452_v43 = vadd.f32 %v1451_v41, %v1450_v39  ;;  %1537 = vmatprep.mubr.bf16.mxu1 %v752_v40 }
 0x153   :  { %v701_v44 = vadd.f32 %v1452_v43, %v1833_v58  ;;  %v732_v46 = vmax.f32 %v700_v42, 0.0 }
 0x155   :  { %v733_v47 = vmax.f32 %v701_v44, 0.0 }
 0x157   :  { %v753_v48 = vpack.c.bf16 %v733_v47, %v732_v46 }
 0x159   :  { %1538 = vmatmul.mubr.bf16.gmra.mrb[36].mxu1 %v753_v48 }
 0x15a   :  { %1541 = vmatprep.mubr.bf16.mxu1 %v1839_v23 }
 0x161   :  { %1542 = vmatmul.mubr.bf16.gmra.mrb[40].mxu1 %v1845_v45 }
 0x162   :  { %1545 = vmatprep.mubr.bf16.mxu1 %v1851_v4 }
 0x169   :  { %1546 = vmatmul.mubr.bf16.gmra.mrb[44].mxu1 %v1857_v22 }
 0x1dc   :  { %v1519_v49 = vpop.f32.mrb[16].mxu1 }
 0x1dd   :  { %v856_v50 = vpop.f32.mrb[17].mxu1 }
 0x1de   :  { %v1520_v51 = vpop.f32.mrb[18].mxu1 }
 0x1df   :  { %v1278_v52 = vpack.c.bf16 %v1520_v51, %v1519_v49  ;;  %v859_v53 = vpop.f32.mrb[19].mxu1 }
 0x1e0   :  { %v1273_v54 = vpack.c.bf16 %v859_v53, %v856_v50 }
 0x1e1   :  { %1350 = vst [vmem:[%s1931_s4 + $0x8] sm:$0xff] %v1278_v52  }
 0x1e2   :  { %1274 = vst [vmem:[%s1931_s4] sm:$0xff] %v1273_v54  }
 0x1ec   :  { %v1523_v58 = vpop.f32.mrb[20].mxu1 }
 0x1ed   :  { %v872_v23 = vpop.f32.mrb[21].mxu1 }
 0x1ee   :  { %v1524_v45 = vpop.f32.mrb[22].mxu1 }
 0x1ef   :  { %v1288_v4 = vpack.c.bf16 %v1524_v45, %v1523_v58  ;;  %v875_v55 = vpop.f32.mrb[23].mxu1 }
 0x1f0   :  { %v1283_v22 = vpack.c.bf16 %v875_v55, %v872_v23 }
 0x1f1   :  { %1352 = vst [vmem:[%s1931_s4 + $0x18] sm:$0xff] %v1288_v4  }
 0x1f2   :  { %1351 = vst [vmem:[%s1931_s4 + $0x10] sm:$0xff] %v1283_v22  }
 0x1fc   :  { %v1527_v56 = vpop.f32.mrb[24].mxu1 }
 0x1fd   :  { %v888_v57 = vpop.f32.mrb[25].mxu1 }
 0x1fe   :  { %v1528_v59 = vpop.f32.mrb[26].mxu1 }
 0x1ff   :  { %v1298_v60 = vpack.c.bf16 %v1528_v59, %v1527_v56  ;;  %v891_v61 = vpop.f32.mrb[27].mxu1 }
 0x200   :  { %v1293_v62 = vpack.c.bf16 %v891_v61, %v888_v57 }
 0x201   :  { %1354 = vst [vmem:[%s1931_s4 + $0x28] sm:$0xff] %v1298_v60  }
 0x202   :  { %1353 = vst [vmem:[%s1931_s4 + $0x20] sm:$0xff] %v1293_v62  }
 0x20c   :  { %v1531_v63 = vpop.f32.mrb[28].mxu1 }
 0x20d   :  { %v904_v0 = vpop.f32.mrb[29].mxu1 }
 0x20e   :  { %v1532_v1 = vpop.f32.mrb[30].mxu1 }
 0x20f   :  { %v1308_v2 = vpack.c.bf16 %v1532_v1, %v1531_v63  ;;  %v907_v3 = vpop.f32.mrb[31].mxu1 }
 0x210   :  { %v1303_v5 = vpack.c.bf16 %v907_v3, %v904_v0 }
 0x211   :  { %1356 = vst [vmem:[%s1931_s4 + $0x38] sm:$0xff] %v1308_v2  }
 0x212   :  { %1355 = vst [vmem:[%s1931_s4 + $0x30] sm:$0xff] %v1303_v5  }
 0x21c   :  { %v1535_v6 = vpop.f32.mrb[32].mxu1 }
 0x21d   :  { %v920_v7 = vpop.f32.mrb[33].mxu1 }
 0x21e   :  { %v1536_v8 = vpop.f32.mrb[34].mxu1 }
 0x21f   :  { %v1318_v9 = vpack.c.bf16 %v1536_v8, %v1535_v6  ;;  %v923_v10 = vpop.f32.mrb[35].mxu1 }
 0x220   :  { %v1313_v11 = vpack.c.bf16 %v923_v10, %v920_v7 }
 0x221   :  { %1358 = vst [vmem:[%s1931_s4 + $0x48] sm:$0xff] %v1318_v9  }
 0x222   :  { %1357 = vst [vmem:[%s1931_s4 + $0x40] sm:$0xff] %v1313_v11  }
 0x22c   :  { %v1539_v12 = vpop.f32.mrb[36].mxu1 }
 0x22d   :  { %v936_v13 = vpop.f32.mrb[37].mxu1 }
 0x22e   :  { %v1540_v14 = vpop.f32.mrb[38].mxu1 }
 0x22f   :  { %v1328_v15 = vpack.c.bf16 %v1540_v14, %v1539_v12  ;;  %v939_v16 = vpop.f32.mrb[39].mxu1 }
 0x230   :  { %v1323_v17 = vpack.c.bf16 %v939_v16, %v936_v13 }
 0x231   :  { %1360 = vst [vmem:[%s1931_s4 + $0x58] sm:$0xff] %v1328_v15  }
 0x232   :  { %1359 = vst [vmem:[%s1931_s4 + $0x50] sm:$0xff] %v1323_v17  }
 0x234   :  { %v1543_v18 = vpop.f32.mrb[40].mxu1 }
 0x235   :  { %v952_v19 = vpop.f32.mrb[41].mxu1 }
 0x236   :  { %v1544_v20 = vpop.f32.mrb[42].mxu1 }
 0x237   :  { %v1338_v21 = vpack.c.bf16 %v1544_v20, %v1543_v18  ;;  %v955_v24 = vpop.f32.mrb[43].mxu1 }
 0x238   :  { %v1333_v25 = vpack.c.bf16 %v955_v24, %v952_v19 }
 0x239   :  { %1362 = vst [vmem:[%s1931_s4 + $0x68] sm:$0xff] %v1338_v21  }
 0x23a   :  { %1361 = vst [vmem:[%s1931_s4 + $0x60] sm:$0xff] %v1333_v25  }
 0x23c   :  { %v1547_v26 = vpop.f32.mrb[44].mxu1 }
 0x23d   :  { %v968_v27 = vpop.f32.mrb[45].mxu1 }
 0x23e   :  { %v1548_v28 = vpop.f32.mrb[46].mxu1 }
 0x23f   :  { %v1348_v29 = vpack.c.bf16 %v1548_v28, %v1547_v26  ;;  %v971_v30 = vpop.f32.mrb[47].mxu1 }
 0x240   :  { %v1343_v31 = vpack.c.bf16 %v971_v30, %v968_v27 }
 0x241   :  { %1364 = vst [vmem:[%s1931_s4 + $0x78] sm:$0xff] %v1348_v29  }
 0x242   :  { %1363 = vst [vmem:[%s1931_s4 + $0x70] sm:$0xff] %v1343_v31  }

</bundles_post_ra>
